<compile_context>
chip_gen: v7x
topology: tpu7x:2x2x1
jax: 0.10.0
libtpu: 0.0.40
codegen_flags: <defaults>
</compile_context>

<pallas_src>
import functools
import math

import jax
import jax.numpy as jnp
import numpy as np
from jax import lax
from jax.experimental import pallas as pl
from jax.experimental.pallas import tpu as pltpu

EPS = 1e-8  # torch F.cosine_similarity epsilon (clamped per-norm)


def _round_up(x, m):
    return ((x + m - 1) // m) * m


def _hcl_kernel(emb_ref, invn_ref, xsel_ref, invsel_ref, own_ref, part_ref,
                loss_ref, *, alpha, hard):
    Rt, _ = xsel_ref.shape
    B = emb_ref.shape[0]

    # Gathered rows of the gram matrix on the MXU: (Rt, D) . (B, D)^T, bf16 / f32 acc.
    row_g = lax.dot_general(xsel_ref[...], emb_ref[...],
                            (((1,), (1,)), ((), ())),
                            preferred_element_type=jnp.float32)          # (Rt, B)

    # cos/tau via reciprocal-norm multiplies (1/tau folded into invsel in the wrapper).
    scaled = row_g * invsel_ref[...] * invn_ref[...]                     # (Rt, B)
    exp_rows = jnp.exp(scaled)                                           # (Rt, B) EUP

    col = lax.broadcasted_iota(jnp.int32, (Rt, B), 1)
    own_hot = col == own_ref[...]                                        # diagonal column
    part_hot = col == part_ref[...]                                      # positive partner column

    pos = jnp.sum(jnp.where(part_hot, exp_rows, 0.0), axis=1, keepdims=True)   # (Rt, 1)

    # Pair mask for the gathered rows only. Valid because the wrapper asserts each
    # sample index appears in at most one positive pair (diag + this row's partner).
    exp_masked = jnp.where(own_hot | part_hot, 0.0, exp_rows)            # (Rt, B)

    ones_col = jnp.ones((B, 1), jnp.bfloat16)

    def mxu_row_count(mask_bool):
        # Exact 0/1 per-row count on the (otherwise idle) MXU, f32 accumulation.
        return jnp.dot(mask_bool.astype(jnp.bfloat16), ones_col,
                       preferred_element_type=jnp.float32)               # (Rt, 1)

    if hard:
        # torch.quantile(alpha, dim=1, interpolation='linear') threshold per row.
        q_pos = alpha * (B - 1)
        k = int(math.floor(q_pos))
        frac = float(q_pos - k)
        k1 = min(k + 1, B - 1)

        # k-th smallest per row via an exact 31-step radix select on the f32 bit
        # patterns (all values >= 0 -> int32 order == float order). Static Python
        # loop -> fully unrolled, bit masks are compile-time constants. `remaining`
        # holds small exact integer counts in f32 (requires B < 2**24, asserted).
        bits = pltpu.bitcast(exp_masked, jnp.int32)                      # (Rt, B)
        prefix = jnp.zeros((Rt, 1), jnp.int32)
        remaining = jnp.full((Rt, 1), float(k), jnp.float32)
        for it in range(31):
            p_bit = 30 - it
            bitval = jnp.int32(1 << p_bit)
            hi_mask = jnp.int32(-(1 << (p_bit + 1)))                     # bits above p_bit
            in_bucket = (bits & hi_mask) == prefix
            bit_zero = (bits & bitval) == 0
            count0 = mxu_row_count(in_bucket & bit_zero)
            take_one = remaining >= count0
            prefix = jnp.where(take_one, prefix | bitval, prefix)
            remaining = jnp.where(take_one, remaining - count0, remaining)
        thr = pltpu.bitcast(prefix, jnp.float32)                         # (Rt, 1) = srt[k]

        if k1 != k and frac > 0.0:
            # srt[k+1] from srt[k] in two passes (no second radix select):
            #   count_le > k+1  =>  srt[k+1] == srt[k]
            #   otherwise       =>  srt[k+1] == min(values > srt[k])
            count_le = mxu_row_count(exp_masked <= thr)                  # >= k+1 always
            min_gt = jnp.min(jnp.where(exp_masked > thr, exp_masked, jnp.inf),
                             axis=1, keepdims=True)
            thr_hi = jnp.where(count_le > float(k + 1), thr, min_gt)
            thr = thr + jnp.float32(frac) * (thr_hi - thr)

        neg_sum = jnp.sum(jnp.where(exp_masked >= thr, exp_masked, 0.0),
                          axis=1, keepdims=True)                         # (Rt, 1)
    else:
        neg_sum = jnp.sum(exp_masked, axis=1, keepdims=True)             # (Rt, 1)

    loss_rows = -jnp.log(pos / (pos + neg_sum))                          # (Rt, 1)
    valid = part_ref[...] >= 0                                           # padded rows -> False
    loss_ref[...] = jnp.where(valid, loss_rows, 0.0)


def hard_contrastive_loss(embeddings, positive_pairs, stage="train", tau=0.2,
                          alpha=0.8, rows_per_tile=256):
    """Pallas-backed equivalent of HardContrastiveLoss(tau, alpha).forward(...)."""
    x = jnp.asarray(embeddings, jnp.float32)
    B, D = x.shape
    assert B < (1 << 24), "radix-select rank counters are tracked exactly in f32"

    pairs_np = np.asarray(positive_pairs, dtype=np.int32)    # concrete pair indices
    P = int(pairs_np.shape[0])
    R = 2 * P

    flat = pairs_np.reshape(-1)
    if np.unique(flat).size != flat.size:
        raise ValueError("kernel's simplified pair mask assumes each sample index "
                         "appears in at most one positive pair")

    hard = stage in ("train", "sanity_check")

    # Stacked rows: 0..P-1 are the i-side, P..2P-1 the j-side (both loss terms).
    own_np = np.concatenate([pairs_np[:, 0], pairs_np[:, 1]])
    part_np = np.concatenate([pairs_np[:, 1], pairs_np[:, 0]])

    # Row tiling over the stacked-pair dimension. For large R keep roughly
    #   2*B*D (bf16 embeddings) + ~5 * Rt*B*4 (f32 working slabs)  <  ~48 MiB on v7x
    # (v5e/v6e have 128 MiB physical VMEM; Rt can be ~2x larger there).
    if R <= rows_per_tile:
        Rt = _round_up(R, 8)                           # single tile (block == full array)
    else:
        Rt = max(16, (rows_per_tile // 16) * 16)       # multiples of 128 preferred on v5e
    R_pad = _round_up(R, Rt)
    n_tiles = R_pad // Rt
    pad = R_pad - R

    own_p = np.pad(own_np, (0, pad), constant_values=0)      # padded rows read row 0 (benign)
    part_p = np.pad(part_np, (0, pad), constant_values=-1)   # partner -1 marks padded rows

    # Norms from the f32 embeddings (torch-style per-norm eps clamp); reciprocals so
    # the kernel multiplies instead of dividing; 1/tau folded into the row-side factor.
    norm = jnp.sqrt(jnp.sum(x * x, axis=1))                  # (B,)
    inv_norm = 1.0 / jnp.maximum(norm, EPS)
    inv_cols = inv_norm.reshape(1, B)

    x_bf = x.astype(jnp.bfloat16)                            # only the bf16 copy stays resident
    own_j = jnp.asarray(own_p, jnp.int32)
    x_sel = jnp.take(x_bf, own_j, axis=0)                    # (R_pad, D) row gather (no MXU)
    inv_sel_tau = (jnp.take(inv_norm, own_j, axis=0) / float(tau)).reshape(R_pad, 1)

    kernel = functools.partial(_hcl_kernel, alpha=float(alpha), hard=hard)
    loss_rows = pl.pallas_call(
        kernel,
        out_shape=jax.ShapeDtypeStruct((R_pad, 1), jnp.float32),
        grid=(n_tiles,),
        in_specs=[
            pl.BlockSpec((B, D), lambda t: (0, 0)),          # bf16 embeddings: full resident
            pl.BlockSpec((1, B), lambda t: (0, 0)),          # column reciprocal norms
            pl.BlockSpec((Rt, D), lambda t: (t, 0)),         # gathered own rows (pipelined)
            pl.BlockSpec((Rt, 1), lambda t: (t, 0)),         # row reciprocal norms / tau
            pl.BlockSpec((Rt, 1), lambda t: (t, 0)),         # own index per row
            pl.BlockSpec((Rt, 1), lambda t: (t, 0)),         # partner index per row
        ],
        out_specs=pl.BlockSpec((Rt, 1), lambda t: (t, 0)),
        compiler_params=pltpu.CompilerParams(
            dimension_semantics=("parallel",),               # row tiles split across TCs on v7x
            vmem_limit_bytes=48 * 1024 * 1024),              # raise to ~96 MiB on v5e/v6e
    )(x_bf, inv_cols, x_sel, inv_sel_tau,
      jnp.asarray(own_p, jnp.int32).reshape(R_pad, 1),
      jnp.asarray(part_p, jnp.int32).reshape(R_pad, 1))

    return jnp.sum(loss_rows) / (2.0 * P)


# ----------------------------------------------------------------------------- reference
def _linear_quantile_threshold(e, alpha):
    """torch.quantile(..., interpolation='linear') along dim=1, via sort."""
    n = e.shape[1]
    q_pos = alpha * (n - 1)
    k = int(math.floor(q_pos))
    frac = float(q_pos - k)
    k1 = min(k + 1, n - 1)
    srt = jnp.sort(e, axis=1)
    lo = srt[:, k:k + 1]
    hi = srt[:, k1:k1 + 1]
    return lo + jnp.float32(frac) * (hi - lo)


def reference_loss(embeddings, positive_pairs, stage="train", tau=0.2, alpha=0.8,
                   bf16_matmul=False):
    """Pure-JAX reference mirroring the PyTorch module (optionally bf16 gram)."""
    x = embeddings.astype(jnp.float32)
    B = x.shape[0]
    P = positive_pairs.shape[0]
    ii, jj = positive_pairs[:, 0], positive_pairs[:, 1]
    mask = jnp.eye(B, dtype=bool)
    mask = mask.at[ii, jj].set(True)
    mask = mask.at[jj, ii].set(True)
    n = jnp.sqrt(jnp.sum(x * x, axis=1, keepdims=True))
    xm = x.astype(jnp.bfloat16) if bf16_matmul else x
    g = jnp.dot(xm, xm.T, preferred_element_type=jnp.float32)
    cos = g / jnp.maximum(n * n.T, EPS)
    exp_cos = jnp.exp(cos / tau)
    exp_masked = jnp.where(mask, 0.0, exp_cos)
    pos_ij = exp_cos[ii, jj]
    pos_ji = exp_cos[jj, ii]
    exp_i = exp_masked[ii]
    exp_j = exp_masked[jj]
    if stage in ("train", "sanity_check"):
        thr_i = _linear_quantile_threshold(exp_i, alpha)
        thr_j = _linear_quantile_threshold(exp_j, alpha)
        si = jnp.sum(jnp.where(exp_i >= thr_i, exp_i, 0.0), axis=1)
        sj = jnp.sum(jnp.where(exp_j >= thr_j, exp_j, 0.0), axis=1)
    else:
        si = exp_i.sum(axis=1)
        sj = exp_j.sum(axis=1)
    lij = -jnp.log(pos_ij / (pos_ij + si))
    lji = -jnp.log(pos_ji / (pos_ji + sj))
    return (lij + lji).sum() / (2 * P)


if __name__ == "__main__":
    key = jax.random.PRNGKey(0)
    k1, k2 = jax.random.split(key)

    # Case 1: single row-tile. alpha*(B-1) = 18.4 -> exercises the linear-interpolation path.
    B, D = 24, 32
    embeddings = jax.random.normal(k1, (B, D), dtype=jnp.float32)
    positive_pairs = jnp.array([[0, 1], [2, 3], [4, 5], [6, 7]], dtype=jnp.int32)

    loss = jax.block_until_ready(
        hard_contrastive_loss(embeddings, positive_pairs, stage="train", tau=0.2, alpha=0.8))
    ref_bf16 = jax.block_until_ready(
        reference_loss(embeddings, positive_pairs, "train", 0.2, 0.8, bf16_matmul=True))
    np.testing.assert_allclose(np.asarray(loss), np.asarray(ref_bf16), rtol=5e-3, atol=1e-5)
    ref_f32 = jax.block_until_ready(
        reference_loss(embeddings, positive_pairs, "train", 0.2, 0.8, bf16_matmul=False))
    np.testing.assert_allclose(np.asarray(loss), np.asarray(ref_f32), rtol=5e-2, atol=1e-3)

    loss_val = jax.block_until_ready(
        hard_contrastive_loss(embeddings, positive_pairs, stage="val", tau=0.2, alpha=0.8))
    ref_val = jax.block_until_ready(
        reference_loss(embeddings, positive_pairs, "val", 0.2, 0.8, bf16_matmul=True))
    np.testing.assert_allclose(np.asarray(loss_val), np.asarray(ref_val), rtol=5e-3, atol=1e-5)

    # Case 2: multi-tile grid with row padding (R = 18 rows, Rt = 16 -> 2 tiles, 14 padded rows).
    B2, D2 = 40, 64
    emb2 = jax.random.normal(k2, (B2, D2), dtype=jnp.float32)
    pairs2 = jnp.array([[2 * i, 2 * i + 1] for i in range(9)], dtype=jnp.int32)
    loss2 = jax.block_until_ready(
        hard_contrastive_loss(emb2, pairs2, stage="train", tau=0.2, alpha=0.8, rows_per_tile=16))
    ref2 = jax.block_until_ready(
        reference_loss(emb2, pairs2, "train", 0.2, 0.8, bf16_matmul=True))
    np.testing.assert_allclose(np.asarray(loss2), np.asarray(ref2), rtol=5e-3, atol=1e-5)

    print("KERNEL_OK")
</pallas_src>

<mosaic_0001>
module attributes {stable_mosaic.version = 11 : i64} {
  func.func @_hcl_kernel(%arg0: i32, %arg1: memref<24x32xbf16, #tpu.memory_space<vmem>>, %arg2: memref<1x24xf32, #tpu.memory_space<vmem>>, %arg3: memref<8x32xbf16, #tpu.memory_space<vmem>>, %arg4: memref<8x1xf32, #tpu.memory_space<vmem>>, %arg5: memref<8x1xi32, #tpu.memory_space<vmem>>, %arg6: memref<8x1xi32, #tpu.memory_space<vmem>>, %arg7: memref<8x1xf32, #tpu.memory_space<vmem>>) attributes {dimension_semantics = [#tpu.dimension_semantics<parallel>], iteration_bounds = array<i64: 1>, scalar_prefetch = 0 : i64, scratch_operands = 0 : i64, tpu.core_type = #tpu.core_type<tc>, window_params = [{pipeline_mode = #tpu.pipeline_mode<synchronous>, transform_indices = @transform_0, window_bounds = array<i64: 24, 32>}, {pipeline_mode = #tpu.pipeline_mode<synchronous>, transform_indices = @transform_1, window_bounds = array<i64: 1, 24>}, {transform_indices = @transform_2, window_bounds = array<i64: 8, 32>}, {transform_indices = @transform_3, window_bounds = array<i64: 8, 1>}, {transform_indices = @transform_4, window_bounds = array<i64: 8, 1>}, {transform_indices = @transform_5, window_bounds = array<i64: 8, 1>}, {transform_indices = @transform_6, window_bounds = array<i64: 8, 1>}]} {
    %c0 = arith.constant 0 : index
    %c0_0 = arith.constant 0 : index
    %0 = vector.load %arg3[%c0, %c0_0] : memref<8x32xbf16, #tpu.memory_space<vmem>>, vector<8x32xbf16>
    %c0_1 = arith.constant 0 : index
    %c0_2 = arith.constant 0 : index
    %1 = vector.load %arg1[%c0_1, %c0_2] : memref<24x32xbf16, #tpu.memory_space<vmem>>, vector<24x32xbf16>
    %cst = arith.constant dense<0.000000e+00> : vector<8x24xf32>
    %2 = tpu.matmul %0, %1, %cst {dimension_numbers = #tpu.dot_dimension_numbers<[1], [1], [0], [0], [0, 0, 1, 0], [], []>} : vector<8x32xbf16>, vector<24x32xbf16>, vector<8x24xf32> -> vector<8x24xf32>
    %c0_3 = arith.constant 0 : index
    %c0_4 = arith.constant 0 : index
    %3 = vector.load %arg4[%c0_3, %c0_4] : memref<8x1xf32, #tpu.memory_space<vmem>>, vector<8x1xf32>
    %4 = vector.broadcast %3 : vector<8x1xf32> to vector<8x24xf32>
    %5 = arith.mulf %2, %4 : vector<8x24xf32>
    %c0_5 = arith.constant 0 : index
    %c0_6 = arith.constant 0 : index
    %6 = vector.load %arg2[%c0_5, %c0_6] : memref<1x24xf32, #tpu.memory_space<vmem>>, vector<1x24xf32>
    %7 = vector.broadcast %6 : vector<1x24xf32> to vector<8x24xf32>
    %8 = arith.mulf %5, %7 : vector<8x24xf32>
    %9 = math.exp %8 : vector<8x24xf32>
    %10 = tpu.iota {dimensions = array<i32: 1>} : vector<8x24xi32>
    %c0_7 = arith.constant 0 : index
    %c0_8 = arith.constant 0 : index
    %11 = vector.load %arg5[%c0_7, %c0_8] : memref<8x1xi32, #tpu.memory_space<vmem>>, vector<8x1xi32>
    %12 = vector.broadcast %11 : vector<8x1xi32> to vector<8x24xi32>
    %13 = arith.cmpi eq, %10, %12 : vector<8x24xi32>
    %c0_9 = arith.constant 0 : index
    %c0_10 = arith.constant 0 : index
    %14 = vector.load %arg6[%c0_9, %c0_10] : memref<8x1xi32, #tpu.memory_space<vmem>>, vector<8x1xi32>
    %15 = vector.broadcast %14 : vector<8x1xi32> to vector<8x24xi32>
    %16 = arith.cmpi eq, %10, %15 : vector<8x24xi32>
    %cst_11 = arith.constant 0.000000e+00 : f32
    %17 = vector.broadcast %cst_11 : f32 to vector<8x24xf32>
    %18 = arith.select %16, %9, %17 : vector<8x24xi1>, vector<8x24xf32>
    %cst_12 = arith.constant dense<0.000000e+00> : vector<8xf32>
    %19 = vector.multi_reduction <add>, %18, %cst_12 [1] : vector<8x24xf32> to vector<8xf32>
    %20 = vector.shape_cast %19 : vector<8xf32> to vector<8x1xf32>
    %21 = arith.ori %13, %16 : vector<8x24xi1>
    %cst_13 = arith.constant 0.000000e+00 : f32
    %22 = vector.broadcast %cst_13 : f32 to vector<8x24xf32>
    %23 = arith.select %21, %22, %9 : vector<8x24xi1>, vector<8x24xf32>
    %cst_14 = arith.constant 1.000000e+00 : bf16
    %24 = vector.broadcast %cst_14 : bf16 to vector<24x1xbf16>
    %25 = tpu.bitcast %23 : vector<8x24xf32> -> vector<8x24xi32>
    %c0_i32 = arith.constant 0 : i32
    %26 = vector.broadcast %c0_i32 : i32 to vector<8x1xi32>
    %cst_15 = arith.constant 1.800000e+01 : f32
    %27 = vector.broadcast %cst_15 : f32 to vector<8x1xf32>
    %c-2147483648_i32 = arith.constant -2147483648 : i32
    %28 = vector.broadcast %c-2147483648_i32 : i32 to vector<8x24xi32>
    %29 = arith.andi %25, %28 : vector<8x24xi32>
    %30 = vector.broadcast %26 : vector<8x1xi32> to vector<8x24xi32>
    %31 = arith.cmpi eq, %29, %30 : vector<8x24xi32>
    %c1073741824_i32 = arith.constant 1073741824 : i32
    %32 = vector.broadcast %c1073741824_i32 : i32 to vector<8x24xi32>
    %33 = arith.andi %25, %32 : vector<8x24xi32>
    %c0_i32_16 = arith.constant 0 : i32
    %34 = vector.broadcast %c0_i32_16 : i32 to vector<8x24xi32>
    %35 = arith.cmpi eq, %33, %34 : vector<8x24xi32>
    %36 = arith.andi %31, %35 : vector<8x24xi1>
    %37 = arith.extui %36 : vector<8x24xi1> to vector<8x24xi32>
    %38 = arith.sitofp %37 : vector<8x24xi32> to vector<8x24xf32>
    %39 = arith.truncf %38 : vector<8x24xf32> to vector<8x24xbf16>
    %cst_17 = arith.constant dense<0.000000e+00> : vector<8x1xf32>
    %40 = tpu.matmul %39, %24, %cst_17 {dimension_numbers = #tpu.dot_dimension_numbers<[1], [0], [0], [1], [0, 0, 1, 1], [], []>} : vector<8x24xbf16>, vector<24x1xbf16>, vector<8x1xf32> -> vector<8x1xf32>
    %41 = arith.cmpf oge, %27, %40 : vector<8x1xf32>
    %c1073741824_i32_18 = arith.constant 1073741824 : i32
    %42 = vector.broadcast %c1073741824_i32_18 : i32 to vector<8x1xi32>
    %43 = arith.ori %26, %42 : vector<8x1xi32>
    %44 = arith.select %41, %43, %26 : vector<8x1xi1>, vector<8x1xi32>
    %45 = arith.subf %27, %40 : vector<8x1xf32>
    %46 = arith.select %41, %45, %27 : vector<8x1xi1>, vector<8x1xf32>
    %c-1073741824_i32 = arith.constant -1073741824 : i32
    %47 = vector.broadcast %c-1073741824_i32 : i32 to vector<8x24xi32>
    %48 = arith.andi %25, %47 : vector<8x24xi32>
    %49 = vector.broadcast %44 : vector<8x1xi32> to vector<8x24xi32>
    %50 = arith.cmpi eq, %48, %49 : vector<8x24xi32>
    %c536870912_i32 = arith.constant 536870912 : i32
    %51 = vector.broadcast %c536870912_i32 : i32 to vector<8x24xi32>
    %52 = arith.andi %25, %51 : vector<8x24xi32>
    %c0_i32_19 = arith.constant 0 : i32
    %53 = vector.broadcast %c0_i32_19 : i32 to vector<8x24xi32>
    %54 = arith.cmpi eq, %52, %53 : vector<8x24xi32>
    %55 = arith.andi %50, %54 : vector<8x24xi1>
    %56 = arith.extui %55 : vector<8x24xi1> to vector<8x24xi32>
    %57 = arith.sitofp %56 : vector<8x24xi32> to vector<8x24xf32>
    %58 = arith.truncf %57 : vector<8x24xf32> to vector<8x24xbf16>
    %cst_20 = arith.constant dense<0.000000e+00> : vector<8x1xf32>
    %59 = tpu.matmul %58, %24, %cst_20 {dimension_numbers = #tpu.dot_dimension_numbers<[1], [0], [0], [1], [0, 0, 1, 1], [], []>} : vector<8x24xbf16>, vector<24x1xbf16>, vector<8x1xf32> -> vector<8x1xf32>
    %60 = arith.cmpf oge, %46, %59 : vector<8x1xf32>
    %c536870912_i32_21 = arith.constant 536870912 : i32
    %61 = vector.broadcast %c536870912_i32_21 : i32 to vector<8x1xi32>
    %62 = arith.ori %44, %61 : vector<8x1xi32>
    %63 = arith.select %60, %62, %44 : vector<8x1xi1>, vector<8x1xi32>
    %64 = arith.subf %46, %59 : vector<8x1xf32>
    %65 = arith.select %60, %64, %46 : vector<8x1xi1>, vector<8x1xf32>
    %c-536870912_i32 = arith.constant -536870912 : i32
    %66 = vector.broadcast %c-536870912_i32 : i32 to vector<8x24xi32>
    %67 = arith.andi %25, %66 : vector<8x24xi32>
    %68 = vector.broadcast %63 : vector<8x1xi32> to vector<8x24xi32>
    %69 = arith.cmpi eq, %67, %68 : vector<8x24xi32>
    %c268435456_i32 = arith.constant 268435456 : i32
    %70 = vector.broadcast %c268435456_i32 : i32 to vector<8x24xi32>
    %71 = arith.andi %25, %70 : vector<8x24xi32>
    %c0_i32_22 = arith.constant 0 : i32
    %72 = vector.broadcast %c0_i32_22 : i32 to vector<8x24xi32>
    %73 = arith.cmpi eq, %71, %72 : vector<8x24xi32>
    %74 = arith.andi %69, %73 : vector<8x24xi1>
    %75 = arith.extui %74 : vector<8x24xi1> to vector<8x24xi32>
    %76 = arith.sitofp %75 : vector<8x24xi32> to vector<8x24xf32>
    %77 = arith.truncf %76 : vector<8x24xf32> to vector<8x24xbf16>
    %cst_23 = arith.constant dense<0.000000e+00> : vector<8x1xf32>
    %78 = tpu.matmul %77, %24, %cst_23 {dimension_numbers = #tpu.dot_dimension_numbers<[1], [0], [0], [1], [0, 0, 1, 1], [], []>} : vector<8x24xbf16>, vector<24x1xbf16>, vector<8x1xf32> -> vector<8x1xf32>
    %79 = arith.cmpf oge, %65, %78 : vector<8x1xf32>
    %c268435456_i32_24 = arith.constant 268435456 : i32
    %80 = vector.broadcast %c268435456_i32_24 : i32 to vector<8x1xi32>
    %81 = arith.ori %63, %80 : vector<8x1xi32>
    %82 = arith.select %79, %81, %63 : vector<8x1xi1>, vector<8x1xi32>
    %83 = arith.subf %65, %78 : vector<8x1xf32>
    %84 = arith.select %79, %83, %65 : vector<8x1xi1>, vector<8x1xf32>
    %c-268435456_i32 = arith.constant -268435456 : i32
    %85 = vector.broadcast %c-268435456_i32 : i32 to vector<8x24xi32>
    %86 = arith.andi %25, %85 : vector<8x24xi32>
    %87 = vector.broadcast %82 : vector<8x1xi32> to vector<8x24xi32>
    %88 = arith.cmpi eq, %86, %87 : vector<8x24xi32>
    %c134217728_i32 = arith.constant 134217728 : i32
    %89 = vector.broadcast %c134217728_i32 : i32 to vector<8x24xi32>
    %90 = arith.andi %25, %89 : vector<8x24xi32>
    %c0_i32_25 = arith.constant 0 : i32
    %91 = vector.broadcast %c0_i32_25 : i32 to vector<8x24xi32>
    %92 = arith.cmpi eq, %90, %91 : vector<8x24xi32>
    %93 = arith.andi %88, %92 : vector<8x24xi1>
    %94 = arith.extui %93 : vector<8x24xi1> to vector<8x24xi32>
    %95 = arith.sitofp %94 : vector<8x24xi32> to vector<8x24xf32>
    %96 = arith.truncf %95 : vector<8x24xf32> to vector<8x24xbf16>
    %cst_26 = arith.constant dense<0.000000e+00> : vector<8x1xf32>
    %97 = tpu.matmul %96, %24, %cst_26 {dimension_numbers = #tpu.dot_dimension_numbers<[1], [0], [0], [1], [0, 0, 1, 1], [], []>} : vector<8x24xbf16>, vector<24x1xbf16>, vector<8x1xf32> -> vector<8x1xf32>
    %98 = arith.cmpf oge, %84, %97 : vector<8x1xf32>
    %c134217728_i32_27 = arith.constant 134217728 : i32
    %99 = vector.broadcast %c134217728_i32_27 : i32 to vector<8x1xi32>
    %100 = arith.ori %82, %99 : vector<8x1xi32>
    %101 = arith.select %98, %100, %82 : vector<8x1xi1>, vector<8x1xi32>
    %102 = arith.subf %84, %97 : vector<8x1xf32>
    %103 = arith.select %98, %102, %84 : vector<8x1xi1>, vector<8x1xf32>
    %c-134217728_i32 = arith.constant -134217728 : i32
    %104 = vector.broadcast %c-134217728_i32 : i32 to vector<8x24xi32>
    %105 = arith.andi %25, %104 : vector<8x24xi32>
    %106 = vector.broadcast %101 : vector<8x1xi32> to vector<8x24xi32>
    %107 = arith.cmpi eq, %105, %106 : vector<8x24xi32>
    %c67108864_i32 = arith.constant 67108864 : i32
    %108 = vector.broadcast %c67108864_i32 : i32 to vector<8x24xi32>
    %109 = arith.andi %25, %108 : vector<8x24xi32>
    %c0_i32_28 = arith.constant 0 : i32
    %110 = vector.broadcast %c0_i32_28 : i32 to vector<8x24xi32>
    %111 = arith.cmpi eq, %109, %110 : vector<8x24xi32>
    %112 = arith.andi %107, %111 : vector<8x24xi1>
    %113 = arith.extui %112 : vector<8x24xi1> to vector<8x24xi32>
    %114 = arith.sitofp %113 : vector<8x24xi32> to vector<8x24xf32>
    %115 = arith.truncf %114 : vector<8x24xf32> to vector<8x24xbf16>
    %cst_29 = arith.constant dense<0.000000e+00> : vector<8x1xf32>
    %116 = tpu.matmul %115, %24, %cst_29 {dimension_numbers = #tpu.dot_dimension_numbers<[1], [0], [0], [1], [0, 0, 1, 1], [], []>} : vector<8x24xbf16>, vector<24x1xbf16>, vector<8x1xf32> -> vector<8x1xf32>
    %117 = arith.cmpf oge, %103, %116 : vector<8x1xf32>
    %c67108864_i32_30 = arith.constant 67108864 : i32
    %118 = vector.broadcast %c67108864_i32_30 : i32 to vector<8x1xi32>
    %119 = arith.ori %101, %118 : vector<8x1xi32>
    %120 = arith.select %117, %119, %101 : vector<8x1xi1>, vector<8x1xi32>
    %121 = arith.subf %103, %116 : vector<8x1xf32>
    %122 = arith.select %117, %121, %103 : vector<8x1xi1>, vector<8x1xf32>
    %c-67108864_i32 = arith.constant -67108864 : i32
    %123 = vector.broadcast %c-67108864_i32 : i32 to vector<8x24xi32>
    %124 = arith.andi %25, %123 : vector<8x24xi32>
    %125 = vector.broadcast %120 : vector<8x1xi32> to vector<8x24xi32>
    %126 = arith.cmpi eq, %124, %125 : vector<8x24xi32>
    %c33554432_i32 = arith.constant 33554432 : i32
    %127 = vector.broadcast %c33554432_i32 : i32 to vector<8x24xi32>
    %128 = arith.andi %25, %127 : vector<8x24xi32>
    %c0_i32_31 = arith.constant 0 : i32
    %129 = vector.broadcast %c0_i32_31 : i32 to vector<8x24xi32>
    %130 = arith.cmpi eq, %128, %129 : vector<8x24xi32>
    %131 = arith.andi %126, %130 : vector<8x24xi1>
    %132 = arith.extui %131 : vector<8x24xi1> to vector<8x24xi32>
    %133 = arith.sitofp %132 : vector<8x24xi32> to vector<8x24xf32>
    %134 = arith.truncf %133 : vector<8x24xf32> to vector<8x24xbf16>
    %cst_32 = arith.constant dense<0.000000e+00> : vector<8x1xf32>
    %135 = tpu.matmul %134, %24, %cst_32 {dimension_numbers = #tpu.dot_dimension_numbers<[1], [0], [0], [1], [0, 0, 1, 1], [], []>} : vector<8x24xbf16>, vector<24x1xbf16>, vector<8x1xf32> -> vector<8x1xf32>
    %136 = arith.cmpf oge, %122, %135 : vector<8x1xf32>
    %c33554432_i32_33 = arith.constant 33554432 : i32
    %137 = vector.broadcast %c33554432_i32_33 : i32 to vector<8x1xi32>
    %138 = arith.ori %120, %137 : vector<8x1xi32>
    %139 = arith.select %136, %138, %120 : vector<8x1xi1>, vector<8x1xi32>
    %140 = arith.subf %122, %135 : vector<8x1xf32>
    %141 = arith.select %136, %140, %122 : vector<8x1xi1>, vector<8x1xf32>
    %c-33554432_i32 = arith.constant -33554432 : i32
    %142 = vector.broadcast %c-33554432_i32 : i32 to vector<8x24xi32>
    %143 = arith.andi %25, %142 : vector<8x24xi32>
    %144 = vector.broadcast %139 : vector<8x1xi32> to vector<8x24xi32>
    %145 = arith.cmpi eq, %143, %144 : vector<8x24xi32>
    %c16777216_i32 = arith.constant 16777216 : i32
    %146 = vector.broadcast %c16777216_i32 : i32 to vector<8x24xi32>
    %147 = arith.andi %25, %146 : vector<8x24xi32>
    %c0_i32_34 = arith.constant 0 : i32
    %148 = vector.broadcast %c0_i32_34 : i32 to vector<8x24xi32>
    %149 = arith.cmpi eq, %147, %148 : vector<8x24xi32>
    %150 = arith.andi %145, %149 : vector<8x24xi1>
    %151 = arith.extui %150 : vector<8x24xi1> to vector<8x24xi32>
    %152 = arith.sitofp %151 : vector<8x24xi32> to vector<8x24xf32>
    %153 = arith.truncf %152 : vector<8x24xf32> to vector<8x24xbf16>
    %cst_35 = arith.constant dense<0.000000e+00> : vector<8x1xf32>
    %154 = tpu.matmul %153, %24, %cst_35 {dimension_numbers = #tpu.dot_dimension_numbers<[1], [0], [0], [1], [0, 0, 1, 1], [], []>} : vector<8x24xbf16>, vector<24x1xbf16>, vector<8x1xf32> -> vector<8x1xf32>
    %155 = arith.cmpf oge, %141, %154 : vector<8x1xf32>
    %c16777216_i32_36 = arith.constant 16777216 : i32
    %156 = vector.broadcast %c16777216_i32_36 : i32 to vector<8x1xi32>
    %157 = arith.ori %139, %156 : vector<8x1xi32>
    %158 = arith.select %155, %157, %139 : vector<8x1xi1>, vector<8x1xi32>
    %159 = arith.subf %141, %154 : vector<8x1xf32>
    %160 = arith.select %155, %159, %141 : vector<8x1xi1>, vector<8x1xf32>
    %c-16777216_i32 = arith.constant -16777216 : i32
    %161 = vector.broadcast %c-16777216_i32 : i32 to vector<8x24xi32>
    %162 = arith.andi %25, %161 : vector<8x24xi32>
    %163 = vector.broadcast %158 : vector<8x1xi32> to vector<8x24xi32>
    %164 = arith.cmpi eq, %162, %163 : vector<8x24xi32>
    %c8388608_i32 = arith.constant 8388608 : i32
    %165 = vector.broadcast %c8388608_i32 : i32 to vector<8x24xi32>
    %166 = arith.andi %25, %165 : vector<8x24xi32>
    %c0_i32_37 = arith.constant 0 : i32
    %167 = vector.broadcast %c0_i32_37 : i32 to vector<8x24xi32>
    %168 = arith.cmpi eq, %166, %167 : vector<8x24xi32>
    %169 = arith.andi %164, %168 : vector<8x24xi1>
    %170 = arith.extui %169 : vector<8x24xi1> to vector<8x24xi32>
    %171 = arith.sitofp %170 : vector<8x24xi32> to vector<8x24xf32>
    %172 = arith.truncf %171 : vector<8x24xf32> to vector<8x24xbf16>
    %cst_38 = arith.constant dense<0.000000e+00> : vector<8x1xf32>
    %173 = tpu.matmul %172, %24, %cst_38 {dimension_numbers = #tpu.dot_dimension_numbers<[1], [0], [0], [1], [0, 0, 1, 1], [], []>} : vector<8x24xbf16>, vector<24x1xbf16>, vector<8x1xf32> -> vector<8x1xf32>
    %174 = arith.cmpf oge, %160, %173 : vector<8x1xf32>
    %c8388608_i32_39 = arith.constant 8388608 : i32
    %175 = vector.broadcast %c8388608_i32_39 : i32 to vector<8x1xi32>
    %176 = arith.ori %158, %175 : vector<8x1xi32>
    %177 = arith.select %174, %176, %158 : vector<8x1xi1>, vector<8x1xi32>
    %178 = arith.subf %160, %173 : vector<8x1xf32>
    %179 = arith.select %174, %178, %160 : vector<8x1xi1>, vector<8x1xf32>
    %c-8388608_i32 = arith.constant -8388608 : i32
    %180 = vector.broadcast %c-8388608_i32 : i32 to vector<8x24xi32>
    %181 = arith.andi %25, %180 : vector<8x24xi32>
    %182 = vector.broadcast %177 : vector<8x1xi32> to vector<8x24xi32>
    %183 = arith.cmpi eq, %181, %182 : vector<8x24xi32>
    %c4194304_i32 = arith.constant 4194304 : i32
    %184 = vector.broadcast %c4194304_i32 : i32 to vector<8x24xi32>
    %185 = arith.andi %25, %184 : vector<8x24xi32>
    %c0_i32_40 = arith.constant 0 : i32
    %186 = vector.broadcast %c0_i32_40 : i32 to vector<8x24xi32>
    %187 = arith.cmpi eq, %185, %186 : vector<8x24xi32>
    %188 = arith.andi %183, %187 : vector<8x24xi1>
    %189 = arith.extui %188 : vector<8x24xi1> to vector<8x24xi32>
    %190 = arith.sitofp %189 : vector<8x24xi32> to vector<8x24xf32>
    %191 = arith.truncf %190 : vector<8x24xf32> to vector<8x24xbf16>
    %cst_41 = arith.constant dense<0.000000e+00> : vector<8x1xf32>
    %192 = tpu.matmul %191, %24, %cst_41 {dimension_numbers = #tpu.dot_dimension_numbers<[1], [0], [0], [1], [0, 0, 1, 1], [], []>} : vector<8x24xbf16>, vector<24x1xbf16>, vector<8x1xf32> -> vector<8x1xf32>
    %193 = arith.cmpf oge, %179, %192 : vector<8x1xf32>
    %c4194304_i32_42 = arith.constant 4194304 : i32
    %194 = vector.broadcast %c4194304_i32_42 : i32 to vector<8x1xi32>
    %195 = arith.ori %177, %194 : vector<8x1xi32>
    %196 = arith.select %193, %195, %177 : vector<8x1xi1>, vector<8x1xi32>
    %197 = arith.subf %179, %192 : vector<8x1xf32>
    %198 = arith.select %193, %197, %179 : vector<8x1xi1>, vector<8x1xf32>
    %c-4194304_i32 = arith.constant -4194304 : i32
    %199 = vector.broadcast %c-4194304_i32 : i32 to vector<8x24xi32>
    %200 = arith.andi %25, %199 : vector<8x24xi32>
    %201 = vector.broadcast %196 : vector<8x1xi32> to vector<8x24xi32>
    %202 = arith.cmpi eq, %200, %201 : vector<8x24xi32>
    %c2097152_i32 = arith.constant 2097152 : i32
    %203 = vector.broadcast %c2097152_i32 : i32 to vector<8x24xi32>
    %204 = arith.andi %25, %203 : vector<8x24xi32>
    %c0_i32_43 = arith.constant 0 : i32
    %205 = vector.broadcast %c0_i32_43 : i32 to vector<8x24xi32>
    %206 = arith.cmpi eq, %204, %205 : vector<8x24xi32>
    %207 = arith.andi %202, %206 : vector<8x24xi1>
    %208 = arith.extui %207 : vector<8x24xi1> to vector<8x24xi32>
    %209 = arith.sitofp %208 : vector<8x24xi32> to vector<8x24xf32>
    %210 = arith.truncf %209 : vector<8x24xf32> to vector<8x24xbf16>
    %cst_44 = arith.constant dense<0.000000e+00> : vector<8x1xf32>
    %211 = tpu.matmul %210, %24, %cst_44 {dimension_numbers = #tpu.dot_dimension_numbers<[1], [0], [0], [1], [0, 0, 1, 1], [], []>} : vector<8x24xbf16>, vector<24x1xbf16>, vector<8x1xf32> -> vector<8x1xf32>
    %212 = arith.cmpf oge, %198, %211 : vector<8x1xf32>
    %c2097152_i32_45 = arith.constant 2097152 : i32
    %213 = vector.broadcast %c2097152_i32_45 : i32 to vector<8x1xi32>
    %214 = arith.ori %196, %213 : vector<8x1xi32>
    %215 = arith.select %212, %214, %196 : vector<8x1xi1>, vector<8x1xi32>
    %216 = arith.subf %198, %211 : vector<8x1xf32>
    %217 = arith.select %212, %216, %198 : vector<8x1xi1>, vector<8x1xf32>
    %c-2097152_i32 = arith.constant -2097152 : i32
    %218 = vector.broadcast %c-2097152_i32 : i32 to vector<8x24xi32>
    %219 = arith.andi %25, %218 : vector<8x24xi32>
    %220 = vector.broadcast %215 : vector<8x1xi32> to vector<8x24xi32>
    %221 = arith.cmpi eq, %219, %220 : vector<8x24xi32>
    %c1048576_i32 = arith.constant 1048576 : i32
    %222 = vector.broadcast %c1048576_i32 : i32 to vector<8x24xi32>
    %223 = arith.andi %25, %222 : vector<8x24xi32>
    %c0_i32_46 = arith.constant 0 : i32
    %224 = vector.broadcast %c0_i32_46 : i32 to vector<8x24xi32>
    %225 = arith.cmpi eq, %223, %224 : vector<8x24xi32>
    %226 = arith.andi %221, %225 : vector<8x24xi1>
    %227 = arith.extui %226 : vector<8x24xi1> to vector<8x24xi32>
    %228 = arith.sitofp %227 : vector<8x24xi32> to vector<8x24xf32>
    %229 = arith.truncf %228 : vector<8x24xf32> to vector<8x24xbf16>
    %cst_47 = arith.constant dense<0.000000e+00> : vector<8x1xf32>
    %230 = tpu.matmul %229, %24, %cst_47 {dimension_numbers = #tpu.dot_dimension_numbers<[1], [0], [0], [1], [0, 0, 1, 1], [], []>} : vector<8x24xbf16>, vector<24x1xbf16>, vector<8x1xf32> -> vector<8x1xf32>
    %231 = arith.cmpf oge, %217, %230 : vector<8x1xf32>
    %c1048576_i32_48 = arith.constant 1048576 : i32
    %232 = vector.broadcast %c1048576_i32_48 : i32 to vector<8x1xi32>
    %233 = arith.ori %215, %232 : vector<8x1xi32>
    %234 = arith.select %231, %233, %215 : vector<8x1xi1>, vector<8x1xi32>
    %235 = arith.subf %217, %230 : vector<8x1xf32>
    %236 = arith.select %231, %235, %217 : vector<8x1xi1>, vector<8x1xf32>
    %c-1048576_i32 = arith.constant -1048576 : i32
    %237 = vector.broadcast %c-1048576_i32 : i32 to vector<8x24xi32>
    %238 = arith.andi %25, %237 : vector<8x24xi32>
    %239 = vector.broadcast %234 : vector<8x1xi32> to vector<8x24xi32>
    %240 = arith.cmpi eq, %238, %239 : vector<8x24xi32>
    %c524288_i32 = arith.constant 524288 : i32
    %241 = vector.broadcast %c524288_i32 : i32 to vector<8x24xi32>
    %242 = arith.andi %25, %241 : vector<8x24xi32>
    %c0_i32_49 = arith.constant 0 : i32
    %243 = vector.broadcast %c0_i32_49 : i32 to vector<8x24xi32>
    %244 = arith.cmpi eq, %242, %243 : vector<8x24xi32>
    %245 = arith.andi %240, %244 : vector<8x24xi1>
    %246 = arith.extui %245 : vector<8x24xi1> to vector<8x24xi32>
    %247 = arith.sitofp %246 : vector<8x24xi32> to vector<8x24xf32>
    %248 = arith.truncf %247 : vector<8x24xf32> to vector<8x24xbf16>
    %cst_50 = arith.constant dense<0.000000e+00> : vector<8x1xf32>
    %249 = tpu.matmul %248, %24, %cst_50 {dimension_numbers = #tpu.dot_dimension_numbers<[1], [0], [0], [1], [0, 0, 1, 1], [], []>} : vector<8x24xbf16>, vector<24x1xbf16>, vector<8x1xf32> -> vector<8x1xf32>
    %250 = arith.cmpf oge, %236, %249 : vector<8x1xf32>
    %c524288_i32_51 = arith.constant 524288 : i32
    %251 = vector.broadcast %c524288_i32_51 : i32 to vector<8x1xi32>
    %252 = arith.ori %234, %251 : vector<8x1xi32>
    %253 = arith.select %250, %252, %234 : vector<8x1xi1>, vector<8x1xi32>
    %254 = arith.subf %236, %249 : vector<8x1xf32>
    %255 = arith.select %250, %254, %236 : vector<8x1xi1>, vector<8x1xf32>
    %c-524288_i32 = arith.constant -524288 : i32
    %256 = vector.broadcast %c-524288_i32 : i32 to vector<8x24xi32>
    %257 = arith.andi %25, %256 : vector<8x24xi32>
    %258 = vector.broadcast %253 : vector<8x1xi32> to vector<8x24xi32>
    %259 = arith.cmpi eq, %257, %258 : vector<8x24xi32>
    %c262144_i32 = arith.constant 262144 : i32
    %260 = vector.broadcast %c262144_i32 : i32 to vector<8x24xi32>
    %261 = arith.andi %25, %260 : vector<8x24xi32>
    %c0_i32_52 = arith.constant 0 : i32
    %262 = vector.broadcast %c0_i32_52 : i32 to vector<8x24xi32>
    %263 = arith.cmpi eq, %261, %262 : vector<8x24xi32>
    %264 = arith.andi %259, %263 : vector<8x24xi1>
    %265 = arith.extui %264 : vector<8x24xi1> to vector<8x24xi32>
    %266 = arith.sitofp %265 : vector<8x24xi32> to vector<8x24xf32>
    %267 = arith.truncf %266 : vector<8x24xf32> to vector<8x24xbf16>
    %cst_53 = arith.constant dense<0.000000e+00> : vector<8x1xf32>
    %268 = tpu.matmul %267, %24, %cst_53 {dimension_numbers = #tpu.dot_dimension_numbers<[1], [0], [0], [1], [0, 0, 1, 1], [], []>} : vector<8x24xbf16>, vector<24x1xbf16>, vector<8x1xf32> -> vector<8x1xf32>
    %269 = arith.cmpf oge, %255, %268 : vector<8x1xf32>
    %c262144_i32_54 = arith.constant 262144 : i32
    %270 = vector.broadcast %c262144_i32_54 : i32 to vector<8x1xi32>
    %271 = arith.ori %253, %270 : vector<8x1xi32>
    %272 = arith.select %269, %271, %253 : vector<8x1xi1>, vector<8x1xi32>
    %273 = arith.subf %255, %268 : vector<8x1xf32>
    %274 = arith.select %269, %273, %255 : vector<8x1xi1>, vector<8x1xf32>
    %c-262144_i32 = arith.constant -262144 : i32
    %275 = vector.broadcast %c-262144_i32 : i32 to vector<8x24xi32>
    %276 = arith.andi %25, %275 : vector<8x24xi32>
    %277 = vector.broadcast %272 : vector<8x1xi32> to vector<8x24xi32>
    %278 = arith.cmpi eq, %276, %277 : vector<8x24xi32>
    %c131072_i32 = arith.constant 131072 : i32
    %279 = vector.broadcast %c131072_i32 : i32 to vector<8x24xi32>
    %280 = arith.andi %25, %279 : vector<8x24xi32>
    %c0_i32_55 = arith.constant 0 : i32
    %281 = vector.broadcast %c0_i32_55 : i32 to vector<8x24xi32>
    %282 = arith.cmpi eq, %280, %281 : vector<8x24xi32>
    %283 = arith.andi %278, %282 : vector<8x24xi1>
    %284 = arith.extui %283 : vector<8x24xi1> to vector<8x24xi32>
    %285 = arith.sitofp %284 : vector<8x24xi32> to vector<8x24xf32>
    %286 = arith.truncf %285 : vector<8x24xf32> to vector<8x24xbf16>
    %cst_56 = arith.constant dense<0.000000e+00> : vector<8x1xf32>
    %287 = tpu.matmul %286, %24, %cst_56 {dimension_numbers = #tpu.dot_dimension_numbers<[1], [0], [0], [1], [0, 0, 1, 1], [], []>} : vector<8x24xbf16>, vector<24x1xbf16>, vector<8x1xf32> -> vector<8x1xf32>
    %288 = arith.cmpf oge, %274, %287 : vector<8x1xf32>
    %c131072_i32_57 = arith.constant 131072 : i32
    %289 = vector.broadcast %c131072_i32_57 : i32 to vector<8x1xi32>
    %290 = arith.ori %272, %289 : vector<8x1xi32>
    %291 = arith.select %288, %290, %272 : vector<8x1xi1>, vector<8x1xi32>
    %292 = arith.subf %274, %287 : vector<8x1xf32>
    %293 = arith.select %288, %292, %274 : vector<8x1xi1>, vector<8x1xf32>
    %c-131072_i32 = arith.constant -131072 : i32
    %294 = vector.broadcast %c-131072_i32 : i32 to vector<8x24xi32>
    %295 = arith.andi %25, %294 : vector<8x24xi32>
    %296 = vector.broadcast %291 : vector<8x1xi32> to vector<8x24xi32>
    %297 = arith.cmpi eq, %295, %296 : vector<8x24xi32>
    %c65536_i32 = arith.constant 65536 : i32
    %298 = vector.broadcast %c65536_i32 : i32 to vector<8x24xi32>
    %299 = arith.andi %25, %298 : vector<8x24xi32>
    %c0_i32_58 = arith.constant 0 : i32
    %300 = vector.broadcast %c0_i32_58 : i32 to vector<8x24xi32>
    %301 = arith.cmpi eq, %299, %300 : vector<8x24xi32>
    %302 = arith.andi %297, %301 : vector<8x24xi1>
    %303 = arith.extui %302 : vector<8x24xi1> to vector<8x24xi32>
    %304 = arith.sitofp %303 : vector<8x24xi32> to vector<8x24xf32>
    %305 = arith.truncf %304 : vector<8x24xf32> to vector<8x24xbf16>
    %cst_59 = arith.constant dense<0.000000e+00> : vector<8x1xf32>
    %306 = tpu.matmul %305, %24, %cst_59 {dimension_numbers = #tpu.dot_dimension_numbers<[1], [0], [0], [1], [0, 0, 1, 1], [], []>} : vector<8x24xbf16>, vector<24x1xbf16>, vector<8x1xf32> -> vector<8x1xf32>
    %307 = arith.cmpf oge, %293, %306 : vector<8x1xf32>
    %c65536_i32_60 = arith.constant 65536 : i32
    %308 = vector.broadcast %c65536_i32_60 : i32 to vector<8x1xi32>
    %309 = arith.ori %291, %308 : vector<8x1xi32>
    %310 = arith.select %307, %309, %291 : vector<8x1xi1>, vector<8x1xi32>
    %311 = arith.subf %293, %306 : vector<8x1xf32>
    %312 = arith.select %307, %311, %293 : vector<8x1xi1>, vector<8x1xf32>
    %c-65536_i32 = arith.constant -65536 : i32
    %313 = vector.broadcast %c-65536_i32 : i32 to vector<8x24xi32>
    %314 = arith.andi %25, %313 : vector<8x24xi32>
    %315 = vector.broadcast %310 : vector<8x1xi32> to vector<8x24xi32>
    %316 = arith.cmpi eq, %314, %315 : vector<8x24xi32>
    %c32768_i32 = arith.constant 32768 : i32
    %317 = vector.broadcast %c32768_i32 : i32 to vector<8x24xi32>
    %318 = arith.andi %25, %317 : vector<8x24xi32>
    %c0_i32_61 = arith.constant 0 : i32
    %319 = vector.broadcast %c0_i32_61 : i32 to vector<8x24xi32>
    %320 = arith.cmpi eq, %318, %319 : vector<8x24xi32>
    %321 = arith.andi %316, %320 : vector<8x24xi1>
    %322 = arith.extui %321 : vector<8x24xi1> to vector<8x24xi32>
    %323 = arith.sitofp %322 : vector<8x24xi32> to vector<8x24xf32>
    %324 = arith.truncf %323 : vector<8x24xf32> to vector<8x24xbf16>
    %cst_62 = arith.constant dense<0.000000e+00> : vector<8x1xf32>
    %325 = tpu.matmul %324, %24, %cst_62 {dimension_numbers = #tpu.dot_dimension_numbers<[1], [0], [0], [1], [0, 0, 1, 1], [], []>} : vector<8x24xbf16>, vector<24x1xbf16>, vector<8x1xf32> -> vector<8x1xf32>
    %326 = arith.cmpf oge, %312, %325 : vector<8x1xf32>
    %c32768_i32_63 = arith.constant 32768 : i32
    %327 = vector.broadcast %c32768_i32_63 : i32 to vector<8x1xi32>
    %328 = arith.ori %310, %327 : vector<8x1xi32>
    %329 = arith.select %326, %328, %310 : vector<8x1xi1>, vector<8x1xi32>
    %330 = arith.subf %312, %325 : vector<8x1xf32>
    %331 = arith.select %326, %330, %312 : vector<8x1xi1>, vector<8x1xf32>
    %c-32768_i32 = arith.constant -32768 : i32
    %332 = vector.broadcast %c-32768_i32 : i32 to vector<8x24xi32>
    %333 = arith.andi %25, %332 : vector<8x24xi32>
    %334 = vector.broadcast %329 : vector<8x1xi32> to vector<8x24xi32>
    %335 = arith.cmpi eq, %333, %334 : vector<8x24xi32>
    %c16384_i32 = arith.constant 16384 : i32
    %336 = vector.broadcast %c16384_i32 : i32 to vector<8x24xi32>
    %337 = arith.andi %25, %336 : vector<8x24xi32>
    %c0_i32_64 = arith.constant 0 : i32
    %338 = vector.broadcast %c0_i32_64 : i32 to vector<8x24xi32>
    %339 = arith.cmpi eq, %337, %338 : vector<8x24xi32>
    %340 = arith.andi %335, %339 : vector<8x24xi1>
    %341 = arith.extui %340 : vector<8x24xi1> to vector<8x24xi32>
    %342 = arith.sitofp %341 : vector<8x24xi32> to vector<8x24xf32>
    %343 = arith.truncf %342 : vector<8x24xf32> to vector<8x24xbf16>
    %cst_65 = arith.constant dense<0.000000e+00> : vector<8x1xf32>
    %344 = tpu.matmul %343, %24, %cst_65 {dimension_numbers = #tpu.dot_dimension_numbers<[1], [0], [0], [1], [0, 0, 1, 1], [], []>} : vector<8x24xbf16>, vector<24x1xbf16>, vector<8x1xf32> -> vector<8x1xf32>
    %345 = arith.cmpf oge, %331, %344 : vector<8x1xf32>
    %c16384_i32_66 = arith.constant 16384 : i32
    %346 = vector.broadcast %c16384_i32_66 : i32 to vector<8x1xi32>
    %347 = arith.ori %329, %346 : vector<8x1xi32>
    %348 = arith.select %345, %347, %329 : vector<8x1xi1>, vector<8x1xi32>
    %349 = arith.subf %331, %344 : vector<8x1xf32>
    %350 = arith.select %345, %349, %331 : vector<8x1xi1>, vector<8x1xf32>
    %c-16384_i32 = arith.constant -16384 : i32
    %351 = vector.broadcast %c-16384_i32 : i32 to vector<8x24xi32>
    %352 = arith.andi %25, %351 : vector<8x24xi32>
    %353 = vector.broadcast %348 : vector<8x1xi32> to vector<8x24xi32>
    %354 = arith.cmpi eq, %352, %353 : vector<8x24xi32>
    %c8192_i32 = arith.constant 8192 : i32
    %355 = vector.broadcast %c8192_i32 : i32 to vector<8x24xi32>
    %356 = arith.andi %25, %355 : vector<8x24xi32>
    %c0_i32_67 = arith.constant 0 : i32
    %357 = vector.broadcast %c0_i32_67 : i32 to vector<8x24xi32>
    %358 = arith.cmpi eq, %356, %357 : vector<8x24xi32>
    %359 = arith.andi %354, %358 : vector<8x24xi1>
    %360 = arith.extui %359 : vector<8x24xi1> to vector<8x24xi32>
    %361 = arith.sitofp %360 : vector<8x24xi32> to vector<8x24xf32>
    %362 = arith.truncf %361 : vector<8x24xf32> to vector<8x24xbf16>
    %cst_68 = arith.constant dense<0.000000e+00> : vector<8x1xf32>
    %363 = tpu.matmul %362, %24, %cst_68 {dimension_numbers = #tpu.dot_dimension_numbers<[1], [0], [0], [1], [0, 0, 1, 1], [], []>} : vector<8x24xbf16>, vector<24x1xbf16>, vector<8x1xf32> -> vector<8x1xf32>
    %364 = arith.cmpf oge, %350, %363 : vector<8x1xf32>
    %c8192_i32_69 = arith.constant 8192 : i32
    %365 = vector.broadcast %c8192_i32_69 : i32 to vector<8x1xi32>
    %366 = arith.ori %348, %365 : vector<8x1xi32>
    %367 = arith.select %364, %366, %348 : vector<8x1xi1>, vector<8x1xi32>
    %368 = arith.subf %350, %363 : vector<8x1xf32>
    %369 = arith.select %364, %368, %350 : vector<8x1xi1>, vector<8x1xf32>
    %c-8192_i32 = arith.constant -8192 : i32
    %370 = vector.broadcast %c-8192_i32 : i32 to vector<8x24xi32>
    %371 = arith.andi %25, %370 : vector<8x24xi32>
    %372 = vector.broadcast %367 : vector<8x1xi32> to vector<8x24xi32>
    %373 = arith.cmpi eq, %371, %372 : vector<8x24xi32>
    %c4096_i32 = arith.constant 4096 : i32
    %374 = vector.broadcast %c4096_i32 : i32 to vector<8x24xi32>
    %375 = arith.andi %25, %374 : vector<8x24xi32>
    %c0_i32_70 = arith.constant 0 : i32
    %376 = vector.broadcast %c0_i32_70 : i32 to vector<8x24xi32>
    %377 = arith.cmpi eq, %375, %376 : vector<8x24xi32>
    %378 = arith.andi %373, %377 : vector<8x24xi1>
    %379 = arith.extui %378 : vector<8x24xi1> to vector<8x24xi32>
    %380 = arith.sitofp %379 : vector<8x24xi32> to vector<8x24xf32>
    %381 = arith.truncf %380 : vector<8x24xf32> to vector<8x24xbf16>
    %cst_71 = arith.constant dense<0.000000e+00> : vector<8x1xf32>
    %382 = tpu.matmul %381, %24, %cst_71 {dimension_numbers = #tpu.dot_dimension_numbers<[1], [0], [0], [1], [0, 0, 1, 1], [], []>} : vector<8x24xbf16>, vector<24x1xbf16>, vector<8x1xf32> -> vector<8x1xf32>
    %383 = arith.cmpf oge, %369, %382 : vector<8x1xf32>
    %c4096_i32_72 = arith.constant 4096 : i32
    %384 = vector.broadcast %c4096_i32_72 : i32 to vector<8x1xi32>
    %385 = arith.ori %367, %384 : vector<8x1xi32>
    %386 = arith.select %383, %385, %367 : vector<8x1xi1>, vector<8x1xi32>
    %387 = arith.subf %369, %382 : vector<8x1xf32>
    %388 = arith.select %383, %387, %369 : vector<8x1xi1>, vector<8x1xf32>
    %c-4096_i32 = arith.constant -4096 : i32
    %389 = vector.broadcast %c-4096_i32 : i32 to vector<8x24xi32>
    %390 = arith.andi %25, %389 : vector<8x24xi32>
    %391 = vector.broadcast %386 : vector<8x1xi32> to vector<8x24xi32>
    %392 = arith.cmpi eq, %390, %391 : vector<8x24xi32>
    %c2048_i32 = arith.constant 2048 : i32
    %393 = vector.broadcast %c2048_i32 : i32 to vector<8x24xi32>
    %394 = arith.andi %25, %393 : vector<8x24xi32>
    %c0_i32_73 = arith.constant 0 : i32
    %395 = vector.broadcast %c0_i32_73 : i32 to vector<8x24xi32>
    %396 = arith.cmpi eq, %394, %395 : vector<8x24xi32>
    %397 = arith.andi %392, %396 : vector<8x24xi1>
    %398 = arith.extui %397 : vector<8x24xi1> to vector<8x24xi32>
    %399 = arith.sitofp %398 : vector<8x24xi32> to vector<8x24xf32>
    %400 = arith.truncf %399 : vector<8x24xf32> to vector<8x24xbf16>
    %cst_74 = arith.constant dense<0.000000e+00> : vector<8x1xf32>
    %401 = tpu.matmul %400, %24, %cst_74 {dimension_numbers = #tpu.dot_dimension_numbers<[1], [0], [0], [1], [0, 0, 1, 1], [], []>} : vector<8x24xbf16>, vector<24x1xbf16>, vector<8x1xf32> -> vector<8x1xf32>
    %402 = arith.cmpf oge, %388, %401 : vector<8x1xf32>
    %c2048_i32_75 = arith.constant 2048 : i32
    %403 = vector.broadcast %c2048_i32_75 : i32 to vector<8x1xi32>
    %404 = arith.ori %386, %403 : vector<8x1xi32>
    %405 = arith.select %402, %404, %386 : vector<8x1xi1>, vector<8x1xi32>
    %406 = arith.subf %388, %401 : vector<8x1xf32>
    %407 = arith.select %402, %406, %388 : vector<8x1xi1>, vector<8x1xf32>
    %c-2048_i32 = arith.constant -2048 : i32
    %408 = vector.broadcast %c-2048_i32 : i32 to vector<8x24xi32>
    %409 = arith.andi %25, %408 : vector<8x24xi32>
    %410 = vector.broadcast %405 : vector<8x1xi32> to vector<8x24xi32>
    %411 = arith.cmpi eq, %409, %410 : vector<8x24xi32>
    %c1024_i32 = arith.constant 1024 : i32
    %412 = vector.broadcast %c1024_i32 : i32 to vector<8x24xi32>
    %413 = arith.andi %25, %412 : vector<8x24xi32>
    %c0_i32_76 = arith.constant 0 : i32
    %414 = vector.broadcast %c0_i32_76 : i32 to vector<8x24xi32>
    %415 = arith.cmpi eq, %413, %414 : vector<8x24xi32>
    %416 = arith.andi %411, %415 : vector<8x24xi1>
    %417 = arith.extui %416 : vector<8x24xi1> to vector<8x24xi32>
    %418 = arith.sitofp %417 : vector<8x24xi32> to vector<8x24xf32>
    %419 = arith.truncf %418 : vector<8x24xf32> to vector<8x24xbf16>
    %cst_77 = arith.constant dense<0.000000e+00> : vector<8x1xf32>
    %420 = tpu.matmul %419, %24, %cst_77 {dimension_numbers = #tpu.dot_dimension_numbers<[1], [0], [0], [1], [0, 0, 1, 1], [], []>} : vector<8x24xbf16>, vector<24x1xbf16>, vector<8x1xf32> -> vector<8x1xf32>
    %421 = arith.cmpf oge, %407, %420 : vector<8x1xf32>
    %c1024_i32_78 = arith.constant 1024 : i32
    %422 = vector.broadcast %c1024_i32_78 : i32 to vector<8x1xi32>
    %423 = arith.ori %405, %422 : vector<8x1xi32>
    %424 = arith.select %421, %423, %405 : vector<8x1xi1>, vector<8x1xi32>
    %425 = arith.subf %407, %420 : vector<8x1xf32>
    %426 = arith.select %421, %425, %407 : vector<8x1xi1>, vector<8x1xf32>
    %c-1024_i32 = arith.constant -1024 : i32
    %427 = vector.broadcast %c-1024_i32 : i32 to vector<8x24xi32>
    %428 = arith.andi %25, %427 : vector<8x24xi32>
    %429 = vector.broadcast %424 : vector<8x1xi32> to vector<8x24xi32>
    %430 = arith.cmpi eq, %428, %429 : vector<8x24xi32>
    %c512_i32 = arith.constant 512 : i32
    %431 = vector.broadcast %c512_i32 : i32 to vector<8x24xi32>
    %432 = arith.andi %25, %431 : vector<8x24xi32>
    %c0_i32_79 = arith.constant 0 : i32
    %433 = vector.broadcast %c0_i32_79 : i32 to vector<8x24xi32>
    %434 = arith.cmpi eq, %432, %433 : vector<8x24xi32>
    %435 = arith.andi %430, %434 : vector<8x24xi1>
    %436 = arith.extui %435 : vector<8x24xi1> to vector<8x24xi32>
    %437 = arith.sitofp %436 : vector<8x24xi32> to vector<8x24xf32>
    %438 = arith.truncf %437 : vector<8x24xf32> to vector<8x24xbf16>
    %cst_80 = arith.constant dense<0.000000e+00> : vector<8x1xf32>
    %439 = tpu.matmul %438, %24, %cst_80 {dimension_numbers = #tpu.dot_dimension_numbers<[1], [0], [0], [1], [0, 0, 1, 1], [], []>} : vector<8x24xbf16>, vector<24x1xbf16>, vector<8x1xf32> -> vector<8x1xf32>
    %440 = arith.cmpf oge, %426, %439 : vector<8x1xf32>
    %c512_i32_81 = arith.constant 512 : i32
    %441 = vector.broadcast %c512_i32_81 : i32 to vector<8x1xi32>
    %442 = arith.ori %424, %441 : vector<8x1xi32>
    %443 = arith.select %440, %442, %424 : vector<8x1xi1>, vector<8x1xi32>
    %444 = arith.subf %426, %439 : vector<8x1xf32>
    %445 = arith.select %440, %444, %426 : vector<8x1xi1>, vector<8x1xf32>
    %c-512_i32 = arith.constant -512 : i32
    %446 = vector.broadcast %c-512_i32 : i32 to vector<8x24xi32>
    %447 = arith.andi %25, %446 : vector<8x24xi32>
    %448 = vector.broadcast %443 : vector<8x1xi32> to vector<8x24xi32>
    %449 = arith.cmpi eq, %447, %448 : vector<8x24xi32>
    %c256_i32 = arith.constant 256 : i32
    %450 = vector.broadcast %c256_i32 : i32 to vector<8x24xi32>
    %451 = arith.andi %25, %450 : vector<8x24xi32>
    %c0_i32_82 = arith.constant 0 : i32
    %452 = vector.broadcast %c0_i32_82 : i32 to vector<8x24xi32>
    %453 = arith.cmpi eq, %451, %452 : vector<8x24xi32>
    %454 = arith.andi %449, %453 : vector<8x24xi1>
    %455 = arith.extui %454 : vector<8x24xi1> to vector<8x24xi32>
    %456 = arith.sitofp %455 : vector<8x24xi32> to vector<8x24xf32>
    %457 = arith.truncf %456 : vector<8x24xf32> to vector<8x24xbf16>
    %cst_83 = arith.constant dense<0.000000e+00> : vector<8x1xf32>
    %458 = tpu.matmul %457, %24, %cst_83 {dimension_numbers = #tpu.dot_dimension_numbers<[1], [0], [0], [1], [0, 0, 1, 1], [], []>} : vector<8x24xbf16>, vector<24x1xbf16>, vector<8x1xf32> -> vector<8x1xf32>
    %459 = arith.cmpf oge, %445, %458 : vector<8x1xf32>
    %c256_i32_84 = arith.constant 256 : i32
    %460 = vector.broadcast %c256_i32_84 : i32 to vector<8x1xi32>
    %461 = arith.ori %443, %460 : vector<8x1xi32>
    %462 = arith.select %459, %461, %443 : vector<8x1xi1>, vector<8x1xi32>
    %463 = arith.subf %445, %458 : vector<8x1xf32>
    %464 = arith.select %459, %463, %445 : vector<8x1xi1>, vector<8x1xf32>
    %c-256_i32 = arith.constant -256 : i32
    %465 = vector.broadcast %c-256_i32 : i32 to vector<8x24xi32>
    %466 = arith.andi %25, %465 : vector<8x24xi32>
    %467 = vector.broadcast %462 : vector<8x1xi32> to vector<8x24xi32>
    %468 = arith.cmpi eq, %466, %467 : vector<8x24xi32>
    %c128_i32 = arith.constant 128 : i32
    %469 = vector.broadcast %c128_i32 : i32 to vector<8x24xi32>
    %470 = arith.andi %25, %469 : vector<8x24xi32>
    %c0_i32_85 = arith.constant 0 : i32
    %471 = vector.broadcast %c0_i32_85 : i32 to vector<8x24xi32>
    %472 = arith.cmpi eq, %470, %471 : vector<8x24xi32>
    %473 = arith.andi %468, %472 : vector<8x24xi1>
    %474 = arith.extui %473 : vector<8x24xi1> to vector<8x24xi32>
    %475 = arith.sitofp %474 : vector<8x24xi32> to vector<8x24xf32>
    %476 = arith.truncf %475 : vector<8x24xf32> to vector<8x24xbf16>
    %cst_86 = arith.constant dense<0.000000e+00> : vector<8x1xf32>
    %477 = tpu.matmul %476, %24, %cst_86 {dimension_numbers = #tpu.dot_dimension_numbers<[1], [0], [0], [1], [0, 0, 1, 1], [], []>} : vector<8x24xbf16>, vector<24x1xbf16>, vector<8x1xf32> -> vector<8x1xf32>
    %478 = arith.cmpf oge, %464, %477 : vector<8x1xf32>
    %c128_i32_87 = arith.constant 128 : i32
    %479 = vector.broadcast %c128_i32_87 : i32 to vector<8x1xi32>
    %480 = arith.ori %462, %479 : vector<8x1xi32>
    %481 = arith.select %478, %480, %462 : vector<8x1xi1>, vector<8x1xi32>
    %482 = arith.subf %464, %477 : vector<8x1xf32>
    %483 = arith.select %478, %482, %464 : vector<8x1xi1>, vector<8x1xf32>
    %c-128_i32 = arith.constant -128 : i32
    %484 = vector.broadcast %c-128_i32 : i32 to vector<8x24xi32>
    %485 = arith.andi %25, %484 : vector<8x24xi32>
    %486 = vector.broadcast %481 : vector<8x1xi32> to vector<8x24xi32>
    %487 = arith.cmpi eq, %485, %486 : vector<8x24xi32>
    %c64_i32 = arith.constant 64 : i32
    %488 = vector.broadcast %c64_i32 : i32 to vector<8x24xi32>
    %489 = arith.andi %25, %488 : vector<8x24xi32>
    %c0_i32_88 = arith.constant 0 : i32
    %490 = vector.broadcast %c0_i32_88 : i32 to vector<8x24xi32>
    %491 = arith.cmpi eq, %489, %490 : vector<8x24xi32>
    %492 = arith.andi %487, %491 : vector<8x24xi1>
    %493 = arith.extui %492 : vector<8x24xi1> to vector<8x24xi32>
    %494 = arith.sitofp %493 : vector<8x24xi32> to vector<8x24xf32>
    %495 = arith.truncf %494 : vector<8x24xf32> to vector<8x24xbf16>
    %cst_89 = arith.constant dense<0.000000e+00> : vector<8x1xf32>
    %496 = tpu.matmul %495, %24, %cst_89 {dimension_numbers = #tpu.dot_dimension_numbers<[1], [0], [0], [1], [0, 0, 1, 1], [], []>} : vector<8x24xbf16>, vector<24x1xbf16>, vector<8x1xf32> -> vector<8x1xf32>
    %497 = arith.cmpf oge, %483, %496 : vector<8x1xf32>
    %c64_i32_90 = arith.constant 64 : i32
    %498 = vector.broadcast %c64_i32_90 : i32 to vector<8x1xi32>
    %499 = arith.ori %481, %498 : vector<8x1xi32>
    %500 = arith.select %497, %499, %481 : vector<8x1xi1>, vector<8x1xi32>
    %501 = arith.subf %483, %496 : vector<8x1xf32>
    %502 = arith.select %497, %501, %483 : vector<8x1xi1>, vector<8x1xf32>
    %c-64_i32 = arith.constant -64 : i32
    %503 = vector.broadcast %c-64_i32 : i32 to vector<8x24xi32>
    %504 = arith.andi %25, %503 : vector<8x24xi32>
    %505 = vector.broadcast %500 : vector<8x1xi32> to vector<8x24xi32>
    %506 = arith.cmpi eq, %504, %505 : vector<8x24xi32>
    %c32_i32 = arith.constant 32 : i32
    %507 = vector.broadcast %c32_i32 : i32 to vector<8x24xi32>
    %508 = arith.andi %25, %507 : vector<8x24xi32>
    %c0_i32_91 = arith.constant 0 : i32
    %509 = vector.broadcast %c0_i32_91 : i32 to vector<8x24xi32>
    %510 = arith.cmpi eq, %508, %509 : vector<8x24xi32>
    %511 = arith.andi %506, %510 : vector<8x24xi1>
    %512 = arith.extui %511 : vector<8x24xi1> to vector<8x24xi32>
    %513 = arith.sitofp %512 : vector<8x24xi32> to vector<8x24xf32>
    %514 = arith.truncf %513 : vector<8x24xf32> to vector<8x24xbf16>
    %cst_92 = arith.constant dense<0.000000e+00> : vector<8x1xf32>
    %515 = tpu.matmul %514, %24, %cst_92 {dimension_numbers = #tpu.dot_dimension_numbers<[1], [0], [0], [1], [0, 0, 1, 1], [], []>} : vector<8x24xbf16>, vector<24x1xbf16>, vector<8x1xf32> -> vector<8x1xf32>
    %516 = arith.cmpf oge, %502, %515 : vector<8x1xf32>
    %c32_i32_93 = arith.constant 32 : i32
    %517 = vector.broadcast %c32_i32_93 : i32 to vector<8x1xi32>
    %518 = arith.ori %500, %517 : vector<8x1xi32>
    %519 = arith.select %516, %518, %500 : vector<8x1xi1>, vector<8x1xi32>
    %520 = arith.subf %502, %515 : vector<8x1xf32>
    %521 = arith.select %516, %520, %502 : vector<8x1xi1>, vector<8x1xf32>
    %c-32_i32 = arith.constant -32 : i32
    %522 = vector.broadcast %c-32_i32 : i32 to vector<8x24xi32>
    %523 = arith.andi %25, %522 : vector<8x24xi32>
    %524 = vector.broadcast %519 : vector<8x1xi32> to vector<8x24xi32>
    %525 = arith.cmpi eq, %523, %524 : vector<8x24xi32>
    %c16_i32 = arith.constant 16 : i32
    %526 = vector.broadcast %c16_i32 : i32 to vector<8x24xi32>
    %527 = arith.andi %25, %526 : vector<8x24xi32>
    %c0_i32_94 = arith.constant 0 : i32
    %528 = vector.broadcast %c0_i32_94 : i32 to vector<8x24xi32>
    %529 = arith.cmpi eq, %527, %528 : vector<8x24xi32>
    %530 = arith.andi %525, %529 : vector<8x24xi1>
    %531 = arith.extui %530 : vector<8x24xi1> to vector<8x24xi32>
    %532 = arith.sitofp %531 : vector<8x24xi32> to vector<8x24xf32>
    %533 = arith.truncf %532 : vector<8x24xf32> to vector<8x24xbf16>
    %cst_95 = arith.constant dense<0.000000e+00> : vector<8x1xf32>
    %534 = tpu.matmul %533, %24, %cst_95 {dimension_numbers = #tpu.dot_dimension_numbers<[1], [0], [0], [1], [0, 0, 1, 1], [], []>} : vector<8x24xbf16>, vector<24x1xbf16>, vector<8x1xf32> -> vector<8x1xf32>
    %535 = arith.cmpf oge, %521, %534 : vector<8x1xf32>
    %c16_i32_96 = arith.constant 16 : i32
    %536 = vector.broadcast %c16_i32_96 : i32 to vector<8x1xi32>
    %537 = arith.ori %519, %536 : vector<8x1xi32>
    %538 = arith.select %535, %537, %519 : vector<8x1xi1>, vector<8x1xi32>
    %539 = arith.subf %521, %534 : vector<8x1xf32>
    %540 = arith.select %535, %539, %521 : vector<8x1xi1>, vector<8x1xf32>
    %c-16_i32 = arith.constant -16 : i32
    %541 = vector.broadcast %c-16_i32 : i32 to vector<8x24xi32>
    %542 = arith.andi %25, %541 : vector<8x24xi32>
    %543 = vector.broadcast %538 : vector<8x1xi32> to vector<8x24xi32>
    %544 = arith.cmpi eq, %542, %543 : vector<8x24xi32>
    %c8_i32 = arith.constant 8 : i32
    %545 = vector.broadcast %c8_i32 : i32 to vector<8x24xi32>
    %546 = arith.andi %25, %545 : vector<8x24xi32>
    %c0_i32_97 = arith.constant 0 : i32
    %547 = vector.broadcast %c0_i32_97 : i32 to vector<8x24xi32>
    %548 = arith.cmpi eq, %546, %547 : vector<8x24xi32>
    %549 = arith.andi %544, %548 : vector<8x24xi1>
    %550 = arith.extui %549 : vector<8x24xi1> to vector<8x24xi32>
    %551 = arith.sitofp %550 : vector<8x24xi32> to vector<8x24xf32>
    %552 = arith.truncf %551 : vector<8x24xf32> to vector<8x24xbf16>
    %cst_98 = arith.constant dense<0.000000e+00> : vector<8x1xf32>
    %553 = tpu.matmul %552, %24, %cst_98 {dimension_numbers = #tpu.dot_dimension_numbers<[1], [0], [0], [1], [0, 0, 1, 1], [], []>} : vector<8x24xbf16>, vector<24x1xbf16>, vector<8x1xf32> -> vector<8x1xf32>
    %554 = arith.cmpf oge, %540, %553 : vector<8x1xf32>
    %c8_i32_99 = arith.constant 8 : i32
    %555 = vector.broadcast %c8_i32_99 : i32 to vector<8x1xi32>
    %556 = arith.ori %538, %555 : vector<8x1xi32>
    %557 = arith.select %554, %556, %538 : vector<8x1xi1>, vector<8x1xi32>
    %558 = arith.subf %540, %553 : vector<8x1xf32>
    %559 = arith.select %554, %558, %540 : vector<8x1xi1>, vector<8x1xf32>
    %c-8_i32 = arith.constant -8 : i32
    %560 = vector.broadcast %c-8_i32 : i32 to vector<8x24xi32>
    %561 = arith.andi %25, %560 : vector<8x24xi32>
    %562 = vector.broadcast %557 : vector<8x1xi32> to vector<8x24xi32>
    %563 = arith.cmpi eq, %561, %562 : vector<8x24xi32>
    %c4_i32 = arith.constant 4 : i32
    %564 = vector.broadcast %c4_i32 : i32 to vector<8x24xi32>
    %565 = arith.andi %25, %564 : vector<8x24xi32>
    %c0_i32_100 = arith.constant 0 : i32
    %566 = vector.broadcast %c0_i32_100 : i32 to vector<8x24xi32>
    %567 = arith.cmpi eq, %565, %566 : vector<8x24xi32>
    %568 = arith.andi %563, %567 : vector<8x24xi1>
    %569 = arith.extui %568 : vector<8x24xi1> to vector<8x24xi32>
    %570 = arith.sitofp %569 : vector<8x24xi32> to vector<8x24xf32>
    %571 = arith.truncf %570 : vector<8x24xf32> to vector<8x24xbf16>
    %cst_101 = arith.constant dense<0.000000e+00> : vector<8x1xf32>
    %572 = tpu.matmul %571, %24, %cst_101 {dimension_numbers = #tpu.dot_dimension_numbers<[1], [0], [0], [1], [0, 0, 1, 1], [], []>} : vector<8x24xbf16>, vector<24x1xbf16>, vector<8x1xf32> -> vector<8x1xf32>
    %573 = arith.cmpf oge, %559, %572 : vector<8x1xf32>
    %c4_i32_102 = arith.constant 4 : i32
    %574 = vector.broadcast %c4_i32_102 : i32 to vector<8x1xi32>
    %575 = arith.ori %557, %574 : vector<8x1xi32>
    %576 = arith.select %573, %575, %557 : vector<8x1xi1>, vector<8x1xi32>
    %577 = arith.subf %559, %572 : vector<8x1xf32>
    %578 = arith.select %573, %577, %559 : vector<8x1xi1>, vector<8x1xf32>
    %c-4_i32 = arith.constant -4 : i32
    %579 = vector.broadcast %c-4_i32 : i32 to vector<8x24xi32>
    %580 = arith.andi %25, %579 : vector<8x24xi32>
    %581 = vector.broadcast %576 : vector<8x1xi32> to vector<8x24xi32>
    %582 = arith.cmpi eq, %580, %581 : vector<8x24xi32>
    %c2_i32 = arith.constant 2 : i32
    %583 = vector.broadcast %c2_i32 : i32 to vector<8x24xi32>
    %584 = arith.andi %25, %583 : vector<8x24xi32>
    %c0_i32_103 = arith.constant 0 : i32
    %585 = vector.broadcast %c0_i32_103 : i32 to vector<8x24xi32>
    %586 = arith.cmpi eq, %584, %585 : vector<8x24xi32>
    %587 = arith.andi %582, %586 : vector<8x24xi1>
    %588 = arith.extui %587 : vector<8x24xi1> to vector<8x24xi32>
    %589 = arith.sitofp %588 : vector<8x24xi32> to vector<8x24xf32>
    %590 = arith.truncf %589 : vector<8x24xf32> to vector<8x24xbf16>
    %cst_104 = arith.constant dense<0.000000e+00> : vector<8x1xf32>
    %591 = tpu.matmul %590, %24, %cst_104 {dimension_numbers = #tpu.dot_dimension_numbers<[1], [0], [0], [1], [0, 0, 1, 1], [], []>} : vector<8x24xbf16>, vector<24x1xbf16>, vector<8x1xf32> -> vector<8x1xf32>
    %592 = arith.cmpf oge, %578, %591 : vector<8x1xf32>
    %c2_i32_105 = arith.constant 2 : i32
    %593 = vector.broadcast %c2_i32_105 : i32 to vector<8x1xi32>
    %594 = arith.ori %576, %593 : vector<8x1xi32>
    %595 = arith.select %592, %594, %576 : vector<8x1xi1>, vector<8x1xi32>
    %596 = arith.subf %578, %591 : vector<8x1xf32>
    %597 = arith.select %592, %596, %578 : vector<8x1xi1>, vector<8x1xf32>
    %c-2_i32 = arith.constant -2 : i32
    %598 = vector.broadcast %c-2_i32 : i32 to vector<8x24xi32>
    %599 = arith.andi %25, %598 : vector<8x24xi32>
    %600 = vector.broadcast %595 : vector<8x1xi32> to vector<8x24xi32>
    %601 = arith.cmpi eq, %599, %600 : vector<8x24xi32>
    %c1_i32 = arith.constant 1 : i32
    %602 = vector.broadcast %c1_i32 : i32 to vector<8x24xi32>
    %603 = arith.andi %25, %602 : vector<8x24xi32>
    %c0_i32_106 = arith.constant 0 : i32
    %604 = vector.broadcast %c0_i32_106 : i32 to vector<8x24xi32>
    %605 = arith.cmpi eq, %603, %604 : vector<8x24xi32>
    %606 = arith.andi %601, %605 : vector<8x24xi1>
    %607 = arith.extui %606 : vector<8x24xi1> to vector<8x24xi32>
    %608 = arith.sitofp %607 : vector<8x24xi32> to vector<8x24xf32>
    %609 = arith.truncf %608 : vector<8x24xf32> to vector<8x24xbf16>
    %cst_107 = arith.constant dense<0.000000e+00> : vector<8x1xf32>
    %610 = tpu.matmul %609, %24, %cst_107 {dimension_numbers = #tpu.dot_dimension_numbers<[1], [0], [0], [1], [0, 0, 1, 1], [], []>} : vector<8x24xbf16>, vector<24x1xbf16>, vector<8x1xf32> -> vector<8x1xf32>
    %611 = arith.cmpf oge, %597, %610 : vector<8x1xf32>
    %c1_i32_108 = arith.constant 1 : i32
    %612 = vector.broadcast %c1_i32_108 : i32 to vector<8x1xi32>
    %613 = arith.ori %595, %612 : vector<8x1xi32>
    %614 = arith.select %611, %613, %595 : vector<8x1xi1>, vector<8x1xi32>
    %615 = tpu.bitcast %614 : vector<8x1xi32> -> vector<8x1xf32>
    %616 = vector.broadcast %615 : vector<8x1xf32> to vector<8x24xf32>
    %617 = arith.cmpf ole, %23, %616 : vector<8x24xf32>
    %618 = arith.extui %617 : vector<8x24xi1> to vector<8x24xi32>
    %619 = arith.sitofp %618 : vector<8x24xi32> to vector<8x24xf32>
    %620 = arith.truncf %619 : vector<8x24xf32> to vector<8x24xbf16>
    %cst_109 = arith.constant dense<0.000000e+00> : vector<8x1xf32>
    %621 = tpu.matmul %620, %24, %cst_109 {dimension_numbers = #tpu.dot_dimension_numbers<[1], [0], [0], [1], [0, 0, 1, 1], [], []>} : vector<8x24xbf16>, vector<24x1xbf16>, vector<8x1xf32> -> vector<8x1xf32>
    %622 = vector.broadcast %615 : vector<8x1xf32> to vector<8x24xf32>
    %623 = arith.cmpf ogt, %23, %622 : vector<8x24xf32>
    %cst_110 = arith.constant 0x7F800000 : f32
    %624 = vector.broadcast %cst_110 : f32 to vector<8x24xf32>
    %625 = arith.select %623, %23, %624 : vector<8x24xi1>, vector<8x24xf32>
    %cst_111 = arith.constant dense<0x7F800000> : vector<8xf32>
    %626 = vector.multi_reduction <minimumf>, %625, %cst_111 [1] : vector<8x24xf32> to vector<8xf32>
    %627 = vector.shape_cast %626 : vector<8xf32> to vector<8x1xf32>
    %cst_112 = arith.constant 1.900000e+01 : f32
    %628 = vector.broadcast %cst_112 : f32 to vector<8x1xf32>
    %629 = arith.cmpf ogt, %621, %628 : vector<8x1xf32>
    %630 = arith.select %629, %615, %627 : vector<8x1xi1>, vector<8x1xf32>
    %631 = arith.subf %630, %615 : vector<8x1xf32>
    %cst_113 = arith.constant 4.000000e-01 : f32
    %632 = vector.broadcast %cst_113 : f32 to vector<8x1xf32>
    %633 = arith.mulf %632, %631 : vector<8x1xf32>
    %634 = arith.addf %615, %633 : vector<8x1xf32>
    %635 = vector.broadcast %634 : vector<8x1xf32> to vector<8x24xf32>
    %636 = arith.cmpf oge, %23, %635 : vector<8x24xf32>
    %cst_114 = arith.constant 0.000000e+00 : f32
    %637 = vector.broadcast %cst_114 : f32 to vector<8x24xf32>
    %638 = arith.select %636, %23, %637 : vector<8x24xi1>, vector<8x24xf32>
    %cst_115 = arith.constant dense<0.000000e+00> : vector<8xf32>
    %639 = vector.multi_reduction <add>, %638, %cst_115 [1] : vector<8x24xf32> to vector<8xf32>
    %640 = vector.shape_cast %639 : vector<8xf32> to vector<8x1xf32>
    %641 = arith.addf %20, %640 : vector<8x1xf32>
    %642 = arith.divf %20, %641 : vector<8x1xf32>
    %643 = math.log %642 : vector<8x1xf32>
    %cst_116 = arith.constant 0.000000e+00 : f32
    %644 = vector.broadcast %cst_116 : f32 to vector<8x1xf32>
    %645 = arith.subf %644, %643 : vector<8x1xf32>
    %c0_117 = arith.constant 0 : index
    %c0_118 = arith.constant 0 : index
    %646 = vector.load %arg6[%c0_117, %c0_118] : memref<8x1xi32, #tpu.memory_space<vmem>>, vector<8x1xi32>
    %c0_i32_119 = arith.constant 0 : i32
    %647 = vector.broadcast %c0_i32_119 : i32 to vector<8x1xi32>
    %648 = arith.cmpi sge, %646, %647 : vector<8x1xi32>
    %cst_120 = arith.constant 0.000000e+00 : f32
    %649 = vector.broadcast %cst_120 : f32 to vector<8x1xf32>
    %650 = arith.select %648, %645, %649 : vector<8x1xi1>, vector<8x1xf32>
    %c0_121 = arith.constant 0 : index
    %c0_122 = arith.constant 0 : index
    %651 = vector.load %arg7[%c0_121, %c0_122] : memref<8x1xf32, #tpu.memory_space<vmem>>, vector<8x1xf32>
    tpu.vector_store %arg7[%c0_121, %c0_122], %650 {strides = array<i32>} : memref<8x1xf32, #tpu.memory_space<vmem>>, vector<8x1xf32>,
    return
  }
  func.func @transform_0(%arg0: i32) -> (i32, i32) {
    %c0_i32 = arith.constant 0 : i32
    %c0_i32_0 = arith.constant 0 : i32
    %c0_i32_1 = arith.constant 0 : i32
    return %c0_i32, %c0_i32_0 : i32, i32
  }
  func.func @transform_1(%arg0: i32) -> (i32, i32) {
    %c0_i32 = arith.constant 0 : i32
    %c0_i32_0 = arith.constant 0 : i32
    %c0_i32_1 = arith.constant 0 : i32
    return %c0_i32, %c0_i32_0 : i32, i32
  }
  func.func @transform_2(%arg0: i32) -> (i32, i32) {
    %c0_i32 = arith.constant 0 : i32
    %c0_i32_0 = arith.constant 0 : i32
    return %arg0, %c0_i32 : i32, i32
  }
  func.func @transform_3(%arg0: i32) -> (i32, i32) {
    %c0_i32 = arith.constant 0 : i32
    %c0_i32_0 = arith.constant 0 : i32
    return %arg0, %c0_i32 : i32, i32
  }
  func.func @transform_4(%arg0: i32) -> (i32, i32) {
    %c0_i32 = arith.constant 0 : i32
    %c0_i32_0 = arith.constant 0 : i32
    return %arg0, %c0_i32 : i32, i32
  }
  func.func @transform_5(%arg0: i32) -> (i32, i32) {
    %c0_i32 = arith.constant 0 : i32
    %c0_i32_0 = arith.constant 0 : i32
    return %arg0, %c0_i32 : i32, i32
  }
  func.func @transform_6(%arg0: i32) -> (i32, i32) {
    %c0_i32 = arith.constant 0 : i32
    %c0_i32_0 = arith.constant 0 : i32
    return %arg0, %c0_i32 : i32, i32
  }
}

</mosaic_0001>

<bundles_post_ra>
// kernel: tpu_custom_call.1
= control target key start
LH: loop header
LB: loop body
LE: loop exit
PB: predicated region body
PF: predicated region fallthrough
CT: control target
= control target key end

     0   :  { %vm37_vm0 = vcmask 261120   ;;  %v2484_v0 = vmov 0.0   ;;  %vm2485_vm1 = vmmov 0   ;;  %v2486_v2 = vmov 0   ;;  %s2908_s0 = inlined_call_operand.vmem [shape: bf16[24,32], index: 0, kind: input, shape index: {}]   ;;  %s2909_s3 = inlined_call_operand.vmem [shape: f32[8,1], index: 3, kind: input, shape index: {}]   ;;  %s2910_s5 = inlined_call_operand.vmem [shape: s32[8,1], index: 5, kind: input, shape index: {}]   ;;  %s2911_s4 = inlined_call_operand.vmem [shape: s32[8,1], index: 4, kind: input, shape index: {}]   ;;  %s2912_s2 = inlined_call_operand.vmem [shape: bf16[8,32], index: 2, kind: input, shape index: {}]   ;;  %s2913_s1 = inlined_call_operand.vmem [shape: f32[1,24], index: 1, kind: input, shape index: {}]   ;;  %s2914_s6 = inlined_call_operand.vmem [shape: f32[8,1], index: 6, kind: output, shape index: {}]  }
   0x1   :  { %2205 = vmatprep.subr.bf16.mxu0 %v2484_v0  ;;  %v2475_v1 = vld [vmem:[%s2908_s0] sm:$0xff]   ;;  %2209 = vmatprep.mubr.msk.bf16.mxu0 %vm2485_vm1, %v2484_v0  ;;  %v2476_v6 = vld [vmem:[%s2908_s0 + $0x8] ss:$0 sps:$4 sm:$0xff]   ;;  %vm135_vm2 = vcmask 1043456   ;;  %v2487_v10 = vmov 1065369472   ;;  %v104_v21 = vlaneseq }
   0x2   :  { %2473 = vset.pattern.permute.xlu0 %v2486_v2  ;;  %2474 = vset.pattern.permute.xlu1 %v2486_v2  ;;  %v42_v3 = vsel %vm37_vm0, %v2475_v1, 0  ;;  %v87_v4 = vld [vmem:[%s2909_s3] sm:$0xff]  ;;  %v45_v8 = vsel %vm37_vm0, %v2476_v6, 0  ;;  %v2559_v11 = vsel %vm135_vm2, 1065369472, %v2486_v2  ;;  %vm117_vm9 = vcmask 195584  }
   0x3   :  { %v111_v5 = vld [vmem:[%s2910_s5] sm:$0xff]  ;;  %2213 = vmatprep.subr.bf16.mxu1 %v2484_v0  ;;  %2217 = vmatprep.mubr.msk.bf16.mxu1 %vm2485_vm1, %v2484_v0  ;;  %v2570_v22 = vand.u32 127, %v104_v21 }
   0x4   :  { %2206 = vmatpush3.bf16.xpose.msra.mxu0 %v42_v3  ;;  %90 = vperm.xlu0 %2473, %v87_v4   ;;  %v106_v7 = vld [vmem:[%s2911_s4] sm:$0xff] }
   0x5   :  { %2207 = vmatprep.subr.bf16.mxu0 %v2484_v0  ;;  %113 = vperm.xlu1 %2474, %v111_v5   ;;  %v25_v9 = vld [vmem:[%s2912_s2] sm:$0xf] }
   0x6   :  { %2214 = vmatpush3.bf16.msra.mxu1 %v2487_v10  ;;  %v2040_v14 = vld [vmem:[%s2913_s1] ss:$0 sm:$0xff] }
   0x7   :  { %2215 = vmatprep.subr.bf16.mxu1 %v2484_v0 }
   0x8   :  { %108 = vperm.xlu0 %2473, %v106_v7  }
   0xa   :  { %2216 = vmatpush3.bf16.msra.mxu1 %v2559_v11 }
   0xb   :  { %2221 = vmatprep.subr.bf16.mxu1 %v2484_v0 }
   0xc   :  { %2208 = vmatpush3.bf16.xpose.msra.mxu0 %v45_v8 }
   0xd   :  { %2229 = vmatprep.subr.bf16.mxu0 %v2484_v0 }
  0x13   :  { %2210 = vmatmul.mubr.msk.bf16.vlgmr.msra.gmra.mrb[0].mxu0 %vm37_vm0, %v25_v9 }
  0x14   :  { %2233 = vmatprep.mubr.msk.bf16.mxu0 %vm2485_vm1, %v2484_v0  ;;  %2230 = vmatpush3.bf16.msra.mxu0 %v2487_v10 }
  0x15   :  { %2231 = vmatprep.subr.bf16.mxu0 %v2484_v0 }
  0x18   :  { %2232 = vmatpush3.bf16.msra.mxu0 %v2559_v11 }
  0x19   :  { %2245 = vmatprep.subr.bf16.mxu0 %v2484_v0 }
  0x83   :  { %v91_v12 = vpop.permute.xlu0 %90 }
  0x84   :  { %v2572_v23 = vpop.permute.xlu1 %113 }
  0x85   :  { %vm115_vm3 = vcmp.eq.s32.totalorder %v2570_v22, %v2572_v23 }
  0x87   :  { %v109_v24 = vpop.permute.xlu0 %108 }
  0x88   :  { %vm110_vm4 = vcmp.eq.s32.totalorder %v2570_v22, %v109_v24 }
  0x89   :  { %vm121_vm5 = vmor %vm110_vm4, %vm115_vm3 }
  0xe6   :  { %v81_v13 = vpop.f32.mrb[0].mxu0 }
  0xe7   :  { %v93_v15 = vmul.f32 %v91_v12, %v81_v13  ;;  %v2211_v16 = vpop.f32.mrb[1].mxu0 }
  0xe8   :  { %v84_v17 = vpop.f32.mrb[2].mxu0 }
  0xe9   :  { %v101_v18 = vmul.f32 %v2040_v14, %v93_v15  ;;  %v2212_v19 = vpop.f32.mrb[3].mxu0 }
  0xeb   :  { %v102_v20 = vmul.f32 1.442695, %v101_v18 }
  0xed   :  { %2477 = vpow2.f32 %v102_v20 }
  0xf7   :  { %v2577_v25 = vpop.eup %2477 }
  0xf8   :  { %v2583_v26 = vsel %vm121_vm5, 0.0, %v2577_v25 }
  0xf9   :  { %v124_v27 = vand.u32 2147483648, %v2583_v26  ;;  %v126_v28 = vand.u32 1073741824, %v2583_v26  ;;  %v188_v38 = vand.u32 536870912, %v2583_v26  ;;  %v183_v39 = vand.u32 3221225472, %v2583_v26 }
  0xfa   :  { %v247_v51 = vand.u32 268435456, %v2583_v26  ;;  %v242_v52 = vand.u32 3758096384, %v2583_v26  ;;  %v306_v1 = vand.u32 134217728, %v2583_v26  ;;  %v365_v16 = vand.u32 67108864, %v2583_v26 }
  0xfb   :  { %vm125_vm6 = vcmp.eq.s32.totalorder %v124_v27, 0  ;;  %vm127_vm7 = vcmp.eq.s32.totalorder %v126_v28, 0  ;;  %vm189_vm11 = vcmp.eq.s32.totalorder %v188_v38, 0  ;;  %v360_v17 = vand.u32 4160749568, %v2583_v26 }
  0xfc   :  { %vm128_vm8 = vmand %vm125_vm6, %vm127_vm7  ;;  %vm248_vm15 = vcmp.eq.s32.totalorder %v247_v51, 0  ;;  %vm307_vm5 = vcmp.eq.s32.totalorder %v306_v1, 0 }
  0xfd   :  { %v2041_v29 = vsel %vm128_vm8, 1.0, %v2484_v0 }
  0xfe   :  { %v131_v30 = vpack.c.bf16 %v2041_v29, %v2041_v29 }
 0x100   :  { %2218 = vmatmul.mubr.msk.bf16.vlgmr.msra.gmra.mrb[0].mxu1 %vm117_vm9, %v131_v30 }
 0x101   :  { %2222 = vmatpush3.bf16.msra.mxu1 %v2487_v10  ;;  %2225 = vmatprep.mubr.msk.bf16.mxu1 %vm2485_vm1, %v2484_v0 }
 0x102   :  { %2223 = vmatprep.subr.bf16.mxu1 %v2484_v0 }
 0x105   :  { %2224 = vmatpush3.bf16.msra.mxu1 %v2559_v11 }
 0x106   :  { %2237 = vmatprep.subr.bf16.mxu1 %v2484_v0 }
 0x1d3   :  { %v173_v31 = vpop.f32.mrb[0].mxu1 }
 0x1d4   :  { %vm2043_vm10 = vcmp.le.f32.partialorder %v173_v31, 18.0  ;;  %v181_v32 = vsub.f32 18.0, %v173_v31  ;;  %v2219_v33 = vpop.f32.mrb[1].mxu1 }
 0x1d5   :  { %v176_v34 = vpop.f32.mrb[2].mxu1  ;;  %v180_v35 = vsel %vm2043_vm10, 1073741824, %v2486_v2  ;;  %v301_v2 = vand.u32 4026531840, %v2583_v26  ;;  %v424_v33 = vand.u32 33554432, %v2583_v26 }
 0x1d6   :  { %v182_v36 = vsel %vm2043_vm10, %v181_v32, 18.0  ;;  %185 = vperm.xlu1 %2474, %v180_v35   ;;  %v2220_v37 = vpop.f32.mrb[3].mxu1  ;;  %v238_v43 = vor.u32 536870912, %v180_v35  ;;  %vm366_vm10 = vcmp.eq.s32.totalorder %v365_v16, 0  ;;  %v419_v34 = vand.u32 4227858432, %v2583_v26 }
 0x255   :  { %v186_v40 = vpop.permute.xlu1 %185 }
 0x256   :  { %vm187_vm12 = vcmp.eq.s32.totalorder %v183_v39, %v186_v40 }
 0x257   :  { %vm190_vm13 = vmand %vm187_vm12, %vm189_vm11 }
 0x258   :  { %v2044_v41 = vsel %vm190_vm13, 1.0, %v2484_v0 }
 0x259   :  { %v193_v42 = vpack.c.bf16 %v2044_v41, %v2044_v41 }
 0x25b   :  { %2226 = vmatmul.mubr.msk.bf16.vlgmr.msra.gmra.mrb[4].mxu1 %vm117_vm9, %v193_v42 }
 0x25c   :  { %2238 = vmatpush3.bf16.msra.mxu1 %v2487_v10  ;;  %2241 = vmatprep.mubr.msk.bf16.mxu1 %vm2485_vm1, %v2484_v0 }
 0x25d   :  { %2239 = vmatprep.subr.bf16.mxu1 %v2484_v0 }
 0x260   :  { %2240 = vmatpush3.bf16.msra.mxu1 %v2559_v11 }
 0x261   :  { %2253 = vmatprep.subr.bf16.mxu1 %v2484_v0 }
 0x32e   :  { %v231_v44 = vpop.f32.mrb[4].mxu1 }
 0x32f   :  { %vm237_vm14 = vcmp.ge.f32.partialorder %v182_v36, %v231_v44  ;;  %v240_v45 = vsub.f32 %v182_v36, %v231_v44  ;;  %v2227_v46 = vpop.f32.mrb[5].mxu1 }
 0x330   :  { %v234_v47 = vpop.f32.mrb[6].mxu1  ;;  %v239_v48 = vsel %vm237_vm14, %v238_v43, %v180_v35  ;;  %v483_v46 = vand.u32 16777216, %v2583_v26 }
 0x331   :  { %244 = vperm.xlu0 %2473, %v239_v48   ;;  %v2228_v49 = vpop.f32.mrb[7].mxu1  ;;  %v241_v50 = vsel %vm237_vm14, %v240_v45, %v182_v36  ;;  %v297_v56 = vor.u32 268435456, %v239_v48  ;;  %vm425_vm14 = vcmp.eq.s32.totalorder %v424_v33, 0  ;;  %v478_v47 = vand.u32 4261412864, %v2583_v26 }
 0x3b0   :  { %v245_v53 = vpop.permute.xlu0 %244 }
 0x3b1   :  { %vm246_vm0 = vcmp.eq.s32.totalorder %v242_v52, %v245_v53 }
 0x3b2   :  { %vm249_vm2 = vmand %vm246_vm0, %vm248_vm15 }
 0x3b3   :  { %v2046_v54 = vsel %vm249_vm2, 1.0, %v2484_v0 }
 0x3b4   :  { %v252_v55 = vpack.c.bf16 %v2046_v54, %v2046_v54 }
 0x3b6   :  { %2234 = vmatmul.mubr.msk.bf16.vlgmr.msra.gmra.mrb[4].mxu0 %vm117_vm9, %v252_v55 }
 0x3b7   :  { %2246 = vmatpush3.bf16.msra.mxu0 %v2487_v10  ;;  %2249 = vmatprep.mubr.msk.bf16.mxu0 %vm2485_vm1, %v2484_v0 }
 0x3b8   :  { %2247 = vmatprep.subr.bf16.mxu0 %v2484_v0 }
 0x3bb   :  { %2248 = vmatpush3.bf16.msra.mxu0 %v2559_v11 }
 0x3bc   :  { %2261 = vmatprep.subr.bf16.mxu0 %v2484_v0 }
 0x489   :  { %v290_v57 = vpop.f32.mrb[4].mxu0 }
 0x48a   :  { %vm296_vm4 = vcmp.ge.f32.partialorder %v241_v50, %v290_v57  ;;  %v299_v58 = vsub.f32 %v241_v50, %v290_v57  ;;  %v2235_v59 = vpop.f32.mrb[5].mxu0 }
 0x48b   :  { %v293_v60 = vpop.f32.mrb[6].mxu0  ;;  %v298_v61 = vsel %vm296_vm4, %v297_v56, %v239_v48  ;;  %v542_v59 = vand.u32 8388608, %v2583_v26 }
 0x48c   :  { %303 = vperm.xlu1 %2474, %v298_v61   ;;  %v2236_v62 = vpop.f32.mrb[7].mxu0  ;;  %v300_v63 = vsel %vm296_vm4, %v299_v58, %v241_v50  ;;  %v356_v6 = vor.u32 134217728, %v298_v61  ;;  %vm484_vm4 = vcmp.eq.s32.totalorder %v483_v46, 0  ;;  %v537_v60 = vand.u32 4278190080, %v2583_v26 }
 0x50b   :  { %v304_v3 = vpop.permute.xlu1 %303 }
 0x50c   :  { %vm305_vm6 = vcmp.eq.s32.totalorder %v301_v2, %v304_v3 }
 0x50d   :  { %vm308_vm7 = vmand %vm305_vm6, %vm307_vm5 }
 0x50e   :  { %v2048_v4 = vsel %vm308_vm7, 1.0, %v2484_v0 }
 0x50f   :  { %v311_v5 = vpack.c.bf16 %v2048_v4, %v2048_v4 }
 0x511   :  { %2242 = vmatmul.mubr.msk.bf16.vlgmr.msra.gmra.mrb[8].mxu1 %vm117_vm9, %v311_v5 }
 0x512   :  { %2254 = vmatpush3.bf16.msra.mxu1 %v2487_v10  ;;  %2257 = vmatprep.mubr.msk.bf16.mxu1 %vm2485_vm1, %v2484_v0 }
 0x513   :  { %2255 = vmatprep.subr.bf16.mxu1 %v2484_v0 }
 0x516   :  { %2256 = vmatpush3.bf16.msra.mxu1 %v2559_v11 }
 0x517   :  { %2269 = vmatprep.subr.bf16.mxu1 %v2484_v0 }
 0x5e4   :  { %v349_v7 = vpop.f32.mrb[8].mxu1 }
 0x5e5   :  { %vm355_vm8 = vcmp.ge.f32.partialorder %v300_v63, %v349_v7  ;;  %v358_v8 = vsub.f32 %v300_v63, %v349_v7  ;;  %v2243_v9 = vpop.f32.mrb[9].mxu1 }
 0x5e6   :  { %v352_v12 = vpop.f32.mrb[10].mxu1  ;;  %v357_v13 = vsel %vm355_vm8, %v356_v6, %v298_v61  ;;  %v601_v9 = vand.u32 4194304, %v2583_v26 }
 0x5e7   :  { %v2244_v14 = vpop.f32.mrb[11].mxu1  ;;  %362 = vperm.xlu0 %2473, %v357_v13   ;;  %v359_v15 = vsel %vm355_vm8, %v358_v8, %v300_v63  ;;  %v415_v21 = vor.u32 67108864, %v357_v13  ;;  %vm543_vm8 = vcmp.eq.s32.totalorder %v542_v59, 0  ;;  %v596_v12 = vand.u32 4286578688, %v2583_v26 }
 0x666   :  { %v363_v18 = vpop.permute.xlu0 %362 }
 0x667   :  { %vm364_vm11 = vcmp.eq.s32.totalorder %v360_v17, %v363_v18 }
 0x668   :  { %vm367_vm12 = vmand %vm364_vm11, %vm366_vm10 }
 0x669   :  { %v2050_v19 = vsel %vm367_vm12, 1.0, %v2484_v0 }
 0x66a   :  { %v370_v20 = vpack.c.bf16 %v2050_v19, %v2050_v19 }
 0x66c   :  { %2250 = vmatmul.mubr.msk.bf16.vlgmr.msra.gmra.mrb[8].mxu0 %vm117_vm9, %v370_v20 }
 0x66d   :  { %2262 = vmatpush3.bf16.msra.mxu0 %v2487_v10  ;;  %2265 = vmatprep.mubr.msk.bf16.mxu0 %vm2485_vm1, %v2484_v0 }
 0x66e   :  { %2263 = vmatprep.subr.bf16.mxu0 %v2484_v0 }
 0x671   :  { %2264 = vmatpush3.bf16.msra.mxu0 %v2559_v11 }
 0x672   :  { %2277 = vmatprep.subr.bf16.mxu0 %v2484_v0 }
 0x73f   :  { %v408_v24 = vpop.f32.mrb[8].mxu0 }
 0x740   :  { %vm414_vm13 = vcmp.ge.f32.partialorder %v359_v15, %v408_v24  ;;  %v417_v27 = vsub.f32 %v359_v15, %v408_v24  ;;  %v2251_v28 = vpop.f32.mrb[9].mxu0 }
 0x741   :  { %v411_v29 = vpop.f32.mrb[10].mxu0  ;;  %v416_v30 = vsel %vm414_vm13, %v415_v21, %v357_v13  ;;  %v660_v28 = vand.u32 2097152, %v2583_v26 }
 0x742   :  { %421 = vperm.xlu1 %2474, %v416_v30   ;;  %v2252_v31 = vpop.f32.mrb[11].mxu0  ;;  %v418_v32 = vsel %vm414_vm13, %v417_v27, %v359_v15  ;;  %v474_v38 = vor.u32 33554432, %v416_v30  ;;  %vm602_vm13 = vcmp.eq.s32.totalorder %v601_v9, 0  ;;  %v655_v29 = vand.u32 4290772992, %v2583_v26 }
 0x7c1   :  { %v422_v35 = vpop.permute.xlu1 %421 }
 0x7c2   :  { %vm423_vm15 = vcmp.eq.s32.totalorder %v419_v34, %v422_v35 }
 0x7c3   :  { %vm426_vm0 = vmand %vm423_vm15, %vm425_vm14 }
 0x7c4   :  { %v2052_v36 = vsel %vm426_vm0, 1.0, %v2484_v0 }
 0x7c5   :  { %v429_v37 = vpack.c.bf16 %v2052_v36, %v2052_v36 }
 0x7c7   :  { %2258 = vmatmul.mubr.msk.bf16.vlgmr.msra.gmra.mrb[12].mxu1 %vm117_vm9, %v429_v37 }
 0x7c8   :  { %2270 = vmatpush3.bf16.msra.mxu1 %v2487_v10  ;;  %2273 = vmatprep.mubr.msk.bf16.mxu1 %vm2485_vm1, %v2484_v0 }
 0x7c9   :  { %2271 = vmatprep.subr.bf16.mxu1 %v2484_v0 }
 0x7cc   :  { %2272 = vmatpush3.bf16.msra.mxu1 %v2559_v11 }
 0x7cd   :  { %2285 = vmatprep.subr.bf16.mxu1 %v2484_v0 }
 0x89a   :  { %v467_v39 = vpop.f32.mrb[12].mxu1 }
 0x89b   :  { %vm473_vm2 = vcmp.ge.f32.partialorder %v418_v32, %v467_v39  ;;  %v476_v40 = vsub.f32 %v418_v32, %v467_v39  ;;  %v2259_v41 = vpop.f32.mrb[13].mxu1 }
 0x89c   :  { %v470_v42 = vpop.f32.mrb[14].mxu1  ;;  %v475_v43 = vsel %vm473_vm2, %v474_v38, %v416_v30  ;;  %v719_v41 = vand.u32 1048576, %v2583_v26 }
 0x89d   :  { %v2260_v44 = vpop.f32.mrb[15].mxu1  ;;  %480 = vperm.xlu0 %2473, %v475_v43   ;;  %v477_v45 = vsel %vm473_vm2, %v476_v40, %v418_v32  ;;  %v533_v51 = vor.u32 16777216, %v475_v43  ;;  %vm661_vm2 = vcmp.eq.s32.totalorder %v660_v28, 0  ;;  %v714_v42 = vand.u32 4292870144, %v2583_v26 }
 0x91c   :  { %v481_v48 = vpop.permute.xlu0 %480 }
 0x91d   :  { %vm482_vm5 = vcmp.eq.s32.totalorder %v478_v47, %v481_v48 }
 0x91e   :  { %vm485_vm6 = vmand %vm482_vm5, %vm484_vm4 }
 0x91f   :  { %v2054_v49 = vsel %vm485_vm6, 1.0, %v2484_v0 }
 0x920   :  { %v488_v50 = vpack.c.bf16 %v2054_v49, %v2054_v49 }
 0x922   :  { %2266 = vmatmul.mubr.msk.bf16.vlgmr.msra.gmra.mrb[12].mxu0 %vm117_vm9, %v488_v50 }
 0x923   :  { %2278 = vmatpush3.bf16.msra.mxu0 %v2487_v10  ;;  %2281 = vmatprep.mubr.msk.bf16.mxu0 %vm2485_vm1, %v2484_v0 }
 0x924   :  { %2279 = vmatprep.subr.bf16.mxu0 %v2484_v0 }
 0x927   :  { %2280 = vmatpush3.bf16.msra.mxu0 %v2559_v11 }
 0x928   :  { %2293 = vmatprep.subr.bf16.mxu0 %v2484_v0 }
 0x9f5   :  { %v526_v52 = vpop.f32.mrb[12].mxu0 }
 0x9f6   :  { %vm532_vm7 = vcmp.ge.f32.partialorder %v477_v45, %v526_v52  ;;  %v535_v53 = vsub.f32 %v477_v45, %v526_v52  ;;  %v2267_v54 = vpop.f32.mrb[13].mxu0 }
 0x9f7   :  { %v529_v55 = vpop.f32.mrb[14].mxu0  ;;  %v534_v56 = vsel %vm532_vm7, %v533_v51, %v475_v43  ;;  %v778_v54 = vand.u32 524288, %v2583_v26 }
 0x9f8   :  { %539 = vperm.xlu1 %2474, %v534_v56   ;;  %v2268_v57 = vpop.f32.mrb[15].mxu0  ;;  %v536_v58 = vsel %vm532_vm7, %v535_v53, %v477_v45  ;;  %v592_v1 = vor.u32 8388608, %v534_v56  ;;  %vm720_vm7 = vcmp.eq.s32.totalorder %v719_v41, 0  ;;  %v773_v55 = vand.u32 4293918720, %v2583_v26 }
 0xa77   :  { %v540_v61 = vpop.permute.xlu1 %539 }
 0xa78   :  { %vm541_vm10 = vcmp.eq.s32.totalorder %v537_v60, %v540_v61 }
 0xa79   :  { %vm544_vm11 = vmand %vm541_vm10, %vm543_vm8 }
 0xa7a   :  { %v2056_v62 = vsel %vm544_vm11, 1.0, %v2484_v0 }
 0xa7b   :  { %v547_v63 = vpack.c.bf16 %v2056_v62, %v2056_v62 }
 0xa7d   :  { %2274 = vmatmul.mubr.msk.bf16.vlgmr.msra.gmra.mrb[16].mxu1 %vm117_vm9, %v547_v63 }
 0xa7e   :  { %2286 = vmatpush3.bf16.msra.mxu1 %v2487_v10  ;;  %2289 = vmatprep.mubr.msk.bf16.mxu1 %vm2485_vm1, %v2484_v0 }
 0xa7f   :  { %2287 = vmatprep.subr.bf16.mxu1 %v2484_v0 }
 0xa82   :  { %2288 = vmatpush3.bf16.msra.mxu1 %v2559_v11 }
 0xa83   :  { %2301 = vmatprep.subr.bf16.mxu1 %v2484_v0 }
 0xb50   :  { %v585_v2 = vpop.f32.mrb[16].mxu1 }
 0xb51   :  { %vm591_vm12 = vcmp.ge.f32.partialorder %v536_v58, %v585_v2  ;;  %v594_v3 = vsub.f32 %v536_v58, %v585_v2  ;;  %v2275_v4 = vpop.f32.mrb[17].mxu1 }
 0xb52   :  { %v588_v5 = vpop.f32.mrb[18].mxu1  ;;  %v593_v6 = vsel %vm591_vm12, %v592_v1, %v534_v56  ;;  %v837_v4 = vand.u32 262144, %v2583_v26 }
 0xb53   :  { %v2276_v7 = vpop.f32.mrb[19].mxu1  ;;  %598 = vperm.xlu0 %2473, %v593_v6   ;;  %v595_v8 = vsel %vm591_vm12, %v594_v3, %v536_v58  ;;  %v651_v16 = vor.u32 4194304, %v593_v6  ;;  %vm779_vm12 = vcmp.eq.s32.totalorder %v778_v54, 0  ;;  %v832_v5 = vand.u32 4294443008, %v2583_v26 }
 0xbd2   :  { %v599_v13 = vpop.permute.xlu0 %598 }
 0xbd3   :  { %vm600_vm14 = vcmp.eq.s32.totalorder %v596_v12, %v599_v13 }
 0xbd4   :  { %vm603_vm15 = vmand %vm600_vm14, %vm602_vm13 }
 0xbd5   :  { %v2058_v14 = vsel %vm603_vm15, 1.0, %v2484_v0 }
 0xbd6   :  { %v606_v15 = vpack.c.bf16 %v2058_v14, %v2058_v14 }
 0xbd8   :  { %2282 = vmatmul.mubr.msk.bf16.vlgmr.msra.gmra.mrb[16].mxu0 %vm117_vm9, %v606_v15 }
 0xbd9   :  { %2294 = vmatpush3.bf16.msra.mxu0 %v2487_v10  ;;  %2297 = vmatprep.mubr.msk.bf16.mxu0 %vm2485_vm1, %v2484_v0 }
 0xbda   :  { %2295 = vmatprep.subr.bf16.mxu0 %v2484_v0 }
 0xbdd   :  { %2296 = vmatpush3.bf16.msra.mxu0 %v2559_v11 }
 0xbde   :  { %2309 = vmatprep.subr.bf16.mxu0 %v2484_v0 }
 0xcab   :  { %v644_v17 = vpop.f32.mrb[16].mxu0 }
 0xcac   :  { %vm650_vm0 = vcmp.ge.f32.partialorder %v595_v8, %v644_v17  ;;  %v653_v18 = vsub.f32 %v595_v8, %v644_v17  ;;  %v2283_v19 = vpop.f32.mrb[17].mxu0 }
 0xcad   :  { %v647_v20 = vpop.f32.mrb[18].mxu0  ;;  %v652_v21 = vsel %vm650_vm0, %v651_v16, %v593_v6  ;;  %v896_v19 = vand.u32 131072, %v2583_v26 }
 0xcae   :  { %657 = vperm.xlu1 %2474, %v652_v21   ;;  %v2284_v24 = vpop.f32.mrb[19].mxu0  ;;  %v654_v27 = vsel %vm650_vm0, %v653_v18, %v595_v8  ;;  %v710_v33 = vor.u32 2097152, %v652_v21  ;;  %vm838_vm0 = vcmp.eq.s32.totalorder %v837_v4, 0  ;;  %v891_v20 = vand.u32 4294705152, %v2583_v26 }
 0xd2d   :  { %v658_v30 = vpop.permute.xlu1 %657 }
 0xd2e   :  { %vm659_vm4 = vcmp.eq.s32.totalorder %v655_v29, %v658_v30 }
 0xd2f   :  { %vm662_vm5 = vmand %vm659_vm4, %vm661_vm2 }
 0xd30   :  { %v2060_v31 = vsel %vm662_vm5, 1.0, %v2484_v0 }
 0xd31   :  { %v665_v32 = vpack.c.bf16 %v2060_v31, %v2060_v31 }
 0xd33   :  { %2290 = vmatmul.mubr.msk.bf16.vlgmr.msra.gmra.mrb[20].mxu1 %vm117_vm9, %v665_v32 }
 0xd34   :  { %2302 = vmatpush3.bf16.msra.mxu1 %v2487_v10  ;;  %2305 = vmatprep.mubr.msk.bf16.mxu1 %vm2485_vm1, %v2484_v0 }
 0xd35   :  { %2303 = vmatprep.subr.bf16.mxu1 %v2484_v0 }
 0xd38   :  { %2304 = vmatpush3.bf16.msra.mxu1 %v2559_v11 }
 0xd39   :  { %2317 = vmatprep.subr.bf16.mxu1 %v2484_v0 }
 0xe06   :  { %v703_v34 = vpop.f32.mrb[20].mxu1 }
 0xe07   :  { %vm709_vm6 = vcmp.ge.f32.partialorder %v654_v27, %v703_v34  ;;  %v712_v35 = vsub.f32 %v654_v27, %v703_v34  ;;  %v2291_v36 = vpop.f32.mrb[21].mxu1 }
 0xe08   :  { %v706_v37 = vpop.f32.mrb[22].mxu1  ;;  %v711_v38 = vsel %vm709_vm6, %v710_v33, %v652_v21  ;;  %v955_v36 = vand.u32 65536, %v2583_v26 }
 0xe09   :  { %v2292_v39 = vpop.f32.mrb[23].mxu1  ;;  %716 = vperm.xlu0 %2473, %v711_v38   ;;  %v713_v40 = vsel %vm709_vm6, %v712_v35, %v654_v27  ;;  %v769_v46 = vor.u32 1048576, %v711_v38  ;;  %vm897_vm6 = vcmp.eq.s32.totalorder %v896_v19, 0  ;;  %v950_v37 = vand.u32 4294836224, %v2583_v26 }
 0xe88   :  { %v717_v43 = vpop.permute.xlu0 %716 }
 0xe89   :  { %vm718_vm8 = vcmp.eq.s32.totalorder %v714_v42, %v717_v43 }
 0xe8a   :  { %vm721_vm10 = vmand %vm718_vm8, %vm720_vm7 }
 0xe8b   :  { %v2062_v44 = vsel %vm721_vm10, 1.0, %v2484_v0 }
 0xe8c   :  { %v724_v45 = vpack.c.bf16 %v2062_v44, %v2062_v44 }
 0xe8e   :  { %2298 = vmatmul.mubr.msk.bf16.vlgmr.msra.gmra.mrb[20].mxu0 %vm117_vm9, %v724_v45 }
 0xe8f   :  { %2310 = vmatpush3.bf16.msra.mxu0 %v2487_v10  ;;  %2313 = vmatprep.mubr.msk.bf16.mxu0 %vm2485_vm1, %v2484_v0 }
 0xe90   :  { %2311 = vmatprep.subr.bf16.mxu0 %v2484_v0 }
 0xe93   :  { %2312 = vmatpush3.bf16.msra.mxu0 %v2559_v11 }
 0xe94   :  { %2325 = vmatprep.subr.bf16.mxu0 %v2484_v0 }
 0xf61   :  { %v762_v47 = vpop.f32.mrb[20].mxu0 }
 0xf62   :  { %vm768_vm11 = vcmp.ge.f32.partialorder %v713_v40, %v762_v47  ;;  %v771_v48 = vsub.f32 %v713_v40, %v762_v47  ;;  %v2299_v49 = vpop.f32.mrb[21].mxu0 }
 0xf63   :  { %v765_v50 = vpop.f32.mrb[22].mxu0  ;;  %v770_v51 = vsel %vm768_vm11, %v769_v46, %v711_v38  ;;  %v1014_v49 = vand.u32 32768, %v2583_v26 }
 0xf64   :  { %775 = vperm.xlu1 %2474, %v770_v51   ;;  %v2300_v52 = vpop.f32.mrb[23].mxu0  ;;  %v772_v53 = vsel %vm768_vm11, %v771_v48, %v713_v40  ;;  %v828_v59 = vor.u32 524288, %v770_v51  ;;  %vm956_vm11 = vcmp.eq.s32.totalorder %v955_v36, 0  ;;  %v1009_v50 = vand.u32 4294901760, %v2583_v26 }
 0xfe3   :  { %v776_v56 = vpop.permute.xlu1 %775 }
 0xfe4   :  { %vm777_vm13 = vcmp.eq.s32.totalorder %v773_v55, %v776_v56 }
 0xfe5   :  { %vm780_vm14 = vmand %vm777_vm13, %vm779_vm12 }
 0xfe6   :  { %v2064_v57 = vsel %vm780_vm14, 1.0, %v2484_v0 }
 0xfe7   :  { %v783_v58 = vpack.c.bf16 %v2064_v57, %v2064_v57 }
 0xfe9   :  { %2306 = vmatmul.mubr.msk.bf16.vlgmr.msra.gmra.mrb[24].mxu1 %vm117_vm9, %v783_v58 }
 0xfea   :  { %2318 = vmatpush3.bf16.msra.mxu1 %v2487_v10  ;;  %2321 = vmatprep.mubr.msk.bf16.mxu1 %vm2485_vm1, %v2484_v0 }
 0xfeb   :  { %2319 = vmatprep.subr.bf16.mxu1 %v2484_v0 }
 0xfee   :  { %2320 = vmatpush3.bf16.msra.mxu1 %v2559_v11 }
 0xfef   :  { %2333 = vmatprep.subr.bf16.mxu1 %v2484_v0 }
0x10bc   :  { %v821_v60 = vpop.f32.mrb[24].mxu1 }
0x10bd   :  { %vm827_vm15 = vcmp.ge.f32.partialorder %v772_v53, %v821_v60  ;;  %v830_v61 = vsub.f32 %v772_v53, %v821_v60  ;;  %v2307_v62 = vpop.f32.mrb[25].mxu1 }
0x10be   :  { %v824_v63 = vpop.f32.mrb[26].mxu1  ;;  %v829_v1 = vsel %vm827_vm15, %v828_v59, %v770_v51  ;;  %v1073_v62 = vand.u32 16384, %v2583_v26 }
0x10bf   :  { %v2308_v2 = vpop.f32.mrb[27].mxu1  ;;  %834 = vperm.xlu0 %2473, %v829_v1   ;;  %v831_v3 = vsel %vm827_vm15, %v830_v61, %v772_v53  ;;  %v887_v9 = vor.u32 262144, %v829_v1  ;;  %vm1015_vm15 = vcmp.eq.s32.totalorder %v1014_v49, 0  ;;  %v1068_v63 = vand.u32 4294934528, %v2583_v26 }
0x113e   :  { %v835_v6 = vpop.permute.xlu0 %834 }
0x113f   :  { %vm836_vm2 = vcmp.eq.s32.totalorder %v832_v5, %v835_v6 }
0x1140   :  { %vm839_vm4 = vmand %vm836_vm2, %vm838_vm0 }
0x1141   :  { %v2066_v7 = vsel %vm839_vm4, 1.0, %v2484_v0 }
0x1142   :  { %v842_v8 = vpack.c.bf16 %v2066_v7, %v2066_v7 }
0x1144   :  { %2314 = vmatmul.mubr.msk.bf16.vlgmr.msra.gmra.mrb[24].mxu0 %vm117_vm9, %v842_v8 }
0x1145   :  { %2326 = vmatpush3.bf16.msra.mxu0 %v2487_v10  ;;  %2329 = vmatprep.mubr.msk.bf16.mxu0 %vm2485_vm1, %v2484_v0 }
0x1146   :  { %2327 = vmatprep.subr.bf16.mxu0 %v2484_v0 }
0x1149   :  { %2328 = vmatpush3.bf16.msra.mxu0 %v2559_v11 }
0x114a   :  { %2341 = vmatprep.subr.bf16.mxu0 %v2484_v0 }
0x1217   :  { %v880_v12 = vpop.f32.mrb[24].mxu0 }
0x1218   :  { %vm886_vm5 = vcmp.ge.f32.partialorder %v831_v3, %v880_v12  ;;  %v889_v13 = vsub.f32 %v831_v3, %v880_v12  ;;  %v2315_v14 = vpop.f32.mrb[25].mxu0 }
0x1219   :  { %v883_v15 = vpop.f32.mrb[26].mxu0  ;;  %v888_v16 = vsel %vm886_vm5, %v887_v9, %v829_v1  ;;  %v1132_v14 = vand.u32 8192, %v2583_v26 }
0x121a   :  { %893 = vperm.xlu1 %2474, %v888_v16   ;;  %v2316_v17 = vpop.f32.mrb[27].mxu0  ;;  %v890_v18 = vsel %vm886_vm5, %v889_v13, %v831_v3  ;;  %v946_v28 = vor.u32 131072, %v888_v16  ;;  %vm1074_vm5 = vcmp.eq.s32.totalorder %v1073_v62, 0  ;;  %v1127_v15 = vand.u32 4294950912, %v2583_v26 }
0x1299   :  { %v894_v21 = vpop.permute.xlu1 %893 }
0x129a   :  { %vm895_vm7 = vcmp.eq.s32.totalorder %v891_v20, %v894_v21 }
0x129b   :  { %vm898_vm8 = vmand %vm895_vm7, %vm897_vm6 }
0x129c   :  { %v2068_v24 = vsel %vm898_vm8, 1.0, %v2484_v0 }
0x129d   :  { %v901_v27 = vpack.c.bf16 %v2068_v24, %v2068_v24 }
0x129f   :  { %2322 = vmatmul.mubr.msk.bf16.vlgmr.msra.gmra.mrb[28].mxu1 %vm117_vm9, %v901_v27 }
0x12a0   :  { %2334 = vmatpush3.bf16.msra.mxu1 %v2487_v10  ;;  %2337 = vmatprep.mubr.msk.bf16.mxu1 %vm2485_vm1, %v2484_v0 }
0x12a1   :  { %2335 = vmatprep.subr.bf16.mxu1 %v2484_v0 }
0x12a4   :  { %2336 = vmatpush3.bf16.msra.mxu1 %v2559_v11 }
0x12a5   :  { %2349 = vmatprep.subr.bf16.mxu1 %v2484_v0 }
0x1372   :  { %v939_v29 = vpop.f32.mrb[28].mxu1 }
0x1373   :  { %vm945_vm10 = vcmp.ge.f32.partialorder %v890_v18, %v939_v29  ;;  %v948_v30 = vsub.f32 %v890_v18, %v939_v29  ;;  %v2323_v31 = vpop.f32.mrb[29].mxu1 }
0x1374   :  { %v942_v32 = vpop.f32.mrb[30].mxu1  ;;  %v947_v33 = vsel %vm945_vm10, %v946_v28, %v888_v16  ;;  %v1191_v31 = vand.u32 4096, %v2583_v26 }
0x1375   :  { %v2324_v34 = vpop.f32.mrb[31].mxu1  ;;  %952 = vperm.xlu0 %2473, %v947_v33   ;;  %v949_v35 = vsel %vm945_vm10, %v948_v30, %v890_v18  ;;  %v1005_v41 = vor.u32 65536, %v947_v33  ;;  %vm1133_vm10 = vcmp.eq.s32.totalorder %v1132_v14, 0  ;;  %v1186_v32 = vand.u32 4294959104, %v2583_v26 }
0x13f4   :  { %v953_v38 = vpop.permute.xlu0 %952 }
0x13f5   :  { %vm954_vm12 = vcmp.eq.s32.totalorder %v950_v37, %v953_v38 }
0x13f6   :  { %vm957_vm13 = vmand %vm954_vm12, %vm956_vm11 }
0x13f7   :  { %v2070_v39 = vsel %vm957_vm13, 1.0, %v2484_v0 }
0x13f8   :  { %v960_v40 = vpack.c.bf16 %v2070_v39, %v2070_v39 }
0x13fa   :  { %2330 = vmatmul.mubr.msk.bf16.vlgmr.msra.gmra.mrb[28].mxu0 %vm117_vm9, %v960_v40 }
0x13fb   :  { %2342 = vmatpush3.bf16.msra.mxu0 %v2487_v10  ;;  %2345 = vmatprep.mubr.msk.bf16.mxu0 %vm2485_vm1, %v2484_v0 }
0x13fc   :  { %2343 = vmatprep.subr.bf16.mxu0 %v2484_v0 }
0x13ff   :  { %2344 = vmatpush3.bf16.msra.mxu0 %v2559_v11 }
0x1400   :  { %2357 = vmatprep.subr.bf16.mxu0 %v2484_v0 }
0x14cd   :  { %v998_v42 = vpop.f32.mrb[28].mxu0 }
0x14ce   :  { %vm1004_vm14 = vcmp.ge.f32.partialorder %v949_v35, %v998_v42  ;;  %v1007_v43 = vsub.f32 %v949_v35, %v998_v42  ;;  %v2331_v44 = vpop.f32.mrb[29].mxu0 }
0x14cf   :  { %v1001_v45 = vpop.f32.mrb[30].mxu0  ;;  %v1006_v46 = vsel %vm1004_vm14, %v1005_v41, %v947_v33  ;;  %v1250_v44 = vand.u32 2048, %v2583_v26 }
0x14d0   :  { %1011 = vperm.xlu1 %2474, %v1006_v46   ;;  %v2332_v47 = vpop.f32.mrb[31].mxu0  ;;  %v1008_v48 = vsel %vm1004_vm14, %v1007_v43, %v949_v35  ;;  %v1064_v54 = vor.u32 32768, %v1006_v46  ;;  %vm1192_vm14 = vcmp.eq.s32.totalorder %v1191_v31, 0  ;;  %v1245_v45 = vand.u32 4294963200, %v2583_v26 }
0x154f   :  { %v1012_v51 = vpop.permute.xlu1 %1011 }
0x1550   :  { %vm1013_vm0 = vcmp.eq.s32.totalorder %v1009_v50, %v1012_v51 }
0x1551   :  { %vm1016_vm2 = vmand %vm1013_vm0, %vm1015_vm15 }
0x1552   :  { %v2072_v52 = vsel %vm1016_vm2, 1.0, %v2484_v0 }
0x1553   :  { %v1019_v53 = vpack.c.bf16 %v2072_v52, %v2072_v52 }
0x1555   :  { %2338 = vmatmul.mubr.msk.bf16.vlgmr.msra.gmra.mrb[32].mxu1 %vm117_vm9, %v1019_v53 }
0x1556   :  { %2350 = vmatpush3.bf16.msra.mxu1 %v2487_v10  ;;  %2353 = vmatprep.mubr.msk.bf16.mxu1 %vm2485_vm1, %v2484_v0 }
0x1557   :  { %2351 = vmatprep.subr.bf16.mxu1 %v2484_v0 }
0x155a   :  { %2352 = vmatpush3.bf16.msra.mxu1 %v2559_v11 }
0x155b   :  { %2365 = vmatprep.subr.bf16.mxu1 %v2484_v0 }
0x1628   :  { %v1057_v55 = vpop.f32.mrb[32].mxu1 }
0x1629   :  { %vm1063_vm4 = vcmp.ge.f32.partialorder %v1008_v48, %v1057_v55  ;;  %v1066_v56 = vsub.f32 %v1008_v48, %v1057_v55  ;;  %v2339_v57 = vpop.f32.mrb[33].mxu1 }
0x162a   :  { %v1060_v58 = vpop.f32.mrb[34].mxu1  ;;  %v1065_v59 = vsel %vm1063_vm4, %v1064_v54, %v1006_v46  ;;  %v1309_v57 = vand.u32 1024, %v2583_v26 }
0x162b   :  { %v2340_v60 = vpop.f32.mrb[35].mxu1  ;;  %1070 = vperm.xlu0 %2473, %v1065_v59   ;;  %v1067_v61 = vsel %vm1063_vm4, %v1066_v56, %v1008_v48  ;;  %v1123_v4 = vor.u32 16384, %v1065_v59  ;;  %vm1251_vm4 = vcmp.eq.s32.totalorder %v1250_v44, 0  ;;  %v1304_v58 = vand.u32 4294965248, %v2583_v26 }
0x16aa   :  { %v1071_v1 = vpop.permute.xlu0 %1070 }
0x16ab   :  { %vm1072_vm6 = vcmp.eq.s32.totalorder %v1068_v63, %v1071_v1 }
0x16ac   :  { %vm1075_vm7 = vmand %vm1072_vm6, %vm1074_vm5 }
0x16ad   :  { %v2074_v2 = vsel %vm1075_vm7, 1.0, %v2484_v0 }
0x16ae   :  { %v1078_v3 = vpack.c.bf16 %v2074_v2, %v2074_v2 }
0x16b0   :  { %2346 = vmatmul.mubr.msk.bf16.vlgmr.msra.gmra.mrb[32].mxu0 %vm117_vm9, %v1078_v3 }
0x16b1   :  { %2358 = vmatpush3.bf16.msra.mxu0 %v2487_v10  ;;  %2361 = vmatprep.mubr.msk.bf16.mxu0 %vm2485_vm1, %v2484_v0 }
0x16b2   :  { %2359 = vmatprep.subr.bf16.mxu0 %v2484_v0 }
0x16b5   :  { %2360 = vmatpush3.bf16.msra.mxu0 %v2559_v11 }
0x16b6   :  { %2373 = vmatprep.subr.bf16.mxu0 %v2484_v0 }
0x1783   :  { %v1116_v5 = vpop.f32.mrb[32].mxu0 }
0x1784   :  { %vm1122_vm8 = vcmp.ge.f32.partialorder %v1067_v61, %v1116_v5  ;;  %v1125_v6 = vsub.f32 %v1067_v61, %v1116_v5  ;;  %v2347_v7 = vpop.f32.mrb[33].mxu0 }
0x1785   :  { %v1119_v8 = vpop.f32.mrb[34].mxu0  ;;  %v1124_v9 = vsel %vm1122_vm8, %v1123_v4, %v1065_v59  ;;  %v1368_v7 = vand.u32 512, %v2583_v26 }
0x1786   :  { %1129 = vperm.xlu1 %2474, %v1124_v9   ;;  %v2348_v12 = vpop.f32.mrb[35].mxu0  ;;  %v1126_v13 = vsel %vm1122_vm8, %v1125_v6, %v1067_v61  ;;  %v1182_v19 = vor.u32 8192, %v1124_v9  ;;  %vm1310_vm8 = vcmp.eq.s32.totalorder %v1309_v57, 0  ;;  %v1363_v8 = vand.u32 4294966272, %v2583_v26 }
0x1805   :  { %v1130_v16 = vpop.permute.xlu1 %1129 }
0x1806   :  { %vm1131_vm11 = vcmp.eq.s32.totalorder %v1127_v15, %v1130_v16 }
0x1807   :  { %vm1134_vm12 = vmand %vm1131_vm11, %vm1133_vm10 }
0x1808   :  { %v2076_v17 = vsel %vm1134_vm12, 1.0, %v2484_v0 }
0x1809   :  { %v1137_v18 = vpack.c.bf16 %v2076_v17, %v2076_v17 }
0x180b   :  { %2354 = vmatmul.mubr.msk.bf16.vlgmr.msra.gmra.mrb[36].mxu1 %vm117_vm9, %v1137_v18 }
0x180c   :  { %2366 = vmatpush3.bf16.msra.mxu1 %v2487_v10  ;;  %2369 = vmatprep.mubr.msk.bf16.mxu1 %vm2485_vm1, %v2484_v0 }
0x180d   :  { %2367 = vmatprep.subr.bf16.mxu1 %v2484_v0 }
0x1810   :  { %2368 = vmatpush3.bf16.msra.mxu1 %v2559_v11 }
0x1811   :  { %2381 = vmatprep.subr.bf16.mxu1 %v2484_v0 }
0x18de   :  { %v1175_v20 = vpop.f32.mrb[36].mxu1 }
0x18df   :  { %vm1181_vm13 = vcmp.ge.f32.partialorder %v1126_v13, %v1175_v20  ;;  %v1184_v21 = vsub.f32 %v1126_v13, %v1175_v20  ;;  %v2355_v24 = vpop.f32.mrb[37].mxu1 }
0x18e0   :  { %v1178_v27 = vpop.f32.mrb[38].mxu1  ;;  %v1183_v28 = vsel %vm1181_vm13, %v1182_v19, %v1124_v9  ;;  %v1427_v24 = vand.u32 256, %v2583_v26 }
0x18e1   :  { %v2356_v29 = vpop.f32.mrb[39].mxu1  ;;  %1188 = vperm.xlu0 %2473, %v1183_v28   ;;  %v1185_v30 = vsel %vm1181_vm13, %v1184_v21, %v1126_v13  ;;  %v1241_v36 = vor.u32 4096, %v1183_v28  ;;  %vm1369_vm13 = vcmp.eq.s32.totalorder %v1368_v7, 0  ;;  %v1422_v27 = vand.u32 4294966784, %v2583_v26 }
0x1960   :  { %v1189_v33 = vpop.permute.xlu0 %1188 }
0x1961   :  { %vm1190_vm15 = vcmp.eq.s32.totalorder %v1186_v32, %v1189_v33 }
0x1962   :  { %vm1193_vm0 = vmand %vm1190_vm15, %vm1192_vm14 }
0x1963   :  { %v2078_v34 = vsel %vm1193_vm0, 1.0, %v2484_v0 }
0x1964   :  { %v1196_v35 = vpack.c.bf16 %v2078_v34, %v2078_v34 }
0x1966   :  { %2362 = vmatmul.mubr.msk.bf16.vlgmr.msra.gmra.mrb[36].mxu0 %vm117_vm9, %v1196_v35 }
0x1967   :  { %2374 = vmatpush3.bf16.msra.mxu0 %v2487_v10  ;;  %2377 = vmatprep.mubr.msk.bf16.mxu0 %vm2485_vm1, %v2484_v0 }
0x1968   :  { %2375 = vmatprep.subr.bf16.mxu0 %v2484_v0 }
0x196b   :  { %2376 = vmatpush3.bf16.msra.mxu0 %v2559_v11 }
0x196c   :  { %2389 = vmatprep.subr.bf16.mxu0 %v2484_v0 }
0x1a39   :  { %v1234_v37 = vpop.f32.mrb[36].mxu0 }
0x1a3a   :  { %vm1240_vm2 = vcmp.ge.f32.partialorder %v1185_v30, %v1234_v37  ;;  %v1243_v38 = vsub.f32 %v1185_v30, %v1234_v37  ;;  %v2363_v39 = vpop.f32.mrb[37].mxu0 }
0x1a3b   :  { %v1237_v40 = vpop.f32.mrb[38].mxu0  ;;  %v1242_v41 = vsel %vm1240_vm2, %v1241_v36, %v1183_v28  ;;  %v1486_v39 = vand.u32 128, %v2583_v26 }
0x1a3c   :  { %1247 = vperm.xlu1 %2474, %v1242_v41   ;;  %v2364_v42 = vpop.f32.mrb[39].mxu0  ;;  %v1244_v43 = vsel %vm1240_vm2, %v1243_v38, %v1185_v30  ;;  %v1300_v49 = vor.u32 2048, %v1242_v41  ;;  %vm1428_vm2 = vcmp.eq.s32.totalorder %v1427_v24, 0  ;;  %v1481_v40 = vand.u32 4294967040, %v2583_v26 }
0x1abb   :  { %v1248_v46 = vpop.permute.xlu1 %1247 }
0x1abc   :  { %vm1249_vm5 = vcmp.eq.s32.totalorder %v1245_v45, %v1248_v46 }
0x1abd   :  { %vm1252_vm6 = vmand %vm1249_vm5, %vm1251_vm4 }
0x1abe   :  { %v2080_v47 = vsel %vm1252_vm6, 1.0, %v2484_v0 }
0x1abf   :  { %v1255_v48 = vpack.c.bf16 %v2080_v47, %v2080_v47 }
0x1ac1   :  { %2370 = vmatmul.mubr.msk.bf16.vlgmr.msra.gmra.mrb[40].mxu1 %vm117_vm9, %v1255_v48 }
0x1ac2   :  { %2382 = vmatpush3.bf16.msra.mxu1 %v2487_v10  ;;  %2385 = vmatprep.mubr.msk.bf16.mxu1 %vm2485_vm1, %v2484_v0 }
0x1ac3   :  { %2383 = vmatprep.subr.bf16.mxu1 %v2484_v0 }
0x1ac6   :  { %2384 = vmatpush3.bf16.msra.mxu1 %v2559_v11 }
0x1ac7   :  { %2397 = vmatprep.subr.bf16.mxu1 %v2484_v0 }
0x1b94   :  { %v1293_v50 = vpop.f32.mrb[40].mxu1 }
0x1b95   :  { %vm1299_vm7 = vcmp.ge.f32.partialorder %v1244_v43, %v1293_v50  ;;  %v1302_v51 = vsub.f32 %v1244_v43, %v1293_v50  ;;  %v2371_v52 = vpop.f32.mrb[41].mxu1 }
0x1b96   :  { %v1296_v53 = vpop.f32.mrb[42].mxu1  ;;  %v1301_v54 = vsel %vm1299_vm7, %v1300_v49, %v1242_v41  ;;  %v1545_v52 = vand.u32 64, %v2583_v26 }
0x1b97   :  { %v2372_v55 = vpop.f32.mrb[43].mxu1  ;;  %1306 = vperm.xlu0 %2473, %v1301_v54   ;;  %v1303_v56 = vsel %vm1299_vm7, %v1302_v51, %v1244_v43  ;;  %v1359_v62 = vor.u32 1024, %v1301_v54  ;;  %vm1487_vm7 = vcmp.eq.s32.totalorder %v1486_v39, 0  ;;  %v1540_v53 = vand.u32 4294967168, %v2583_v26 }
0x1c16   :  { %v1307_v59 = vpop.permute.xlu0 %1306 }
0x1c17   :  { %vm1308_vm10 = vcmp.eq.s32.totalorder %v1304_v58, %v1307_v59 }
0x1c18   :  { %vm1311_vm11 = vmand %vm1308_vm10, %vm1310_vm8 }
0x1c19   :  { %v2082_v60 = vsel %vm1311_vm11, 1.0, %v2484_v0 }
0x1c1a   :  { %v1314_v61 = vpack.c.bf16 %v2082_v60, %v2082_v60 }
0x1c1c   :  { %2378 = vmatmul.mubr.msk.bf16.vlgmr.msra.gmra.mrb[40].mxu0 %vm117_vm9, %v1314_v61 }
0x1c1d   :  { %2390 = vmatpush3.bf16.msra.mxu0 %v2487_v10  ;;  %2393 = vmatprep.mubr.msk.bf16.mxu0 %vm2485_vm1, %v2484_v0 }
0x1c1e   :  { %2391 = vmatprep.subr.bf16.mxu0 %v2484_v0 }
0x1c21   :  { %2392 = vmatpush3.bf16.msra.mxu0 %v2559_v11 }
0x1c22   :  { %2405 = vmatprep.subr.bf16.mxu0 %v2484_v0 }
0x1cef   :  { %v1352_v63 = vpop.f32.mrb[40].mxu0 }
0x1cf0   :  { %vm1358_vm12 = vcmp.ge.f32.partialorder %v1303_v56, %v1352_v63  ;;  %v1361_v1 = vsub.f32 %v1303_v56, %v1352_v63  ;;  %v2379_v2 = vpop.f32.mrb[41].mxu0 }
0x1cf1   :  { %v1355_v3 = vpop.f32.mrb[42].mxu0  ;;  %v1360_v4 = vsel %vm1358_vm12, %v1359_v62, %v1301_v54  ;;  %v1604_v2 = vand.u32 32, %v2583_v26 }
0x1cf2   :  { %1365 = vperm.xlu1 %2474, %v1360_v4   ;;  %v2380_v5 = vpop.f32.mrb[43].mxu0  ;;  %v1362_v6 = vsel %vm1358_vm12, %v1361_v1, %v1303_v56  ;;  %v1418_v14 = vor.u32 512, %v1360_v4  ;;  %vm1546_vm12 = vcmp.eq.s32.totalorder %v1545_v52, 0  ;;  %v1599_v3 = vand.u32 4294967232, %v2583_v26 }
0x1d71   :  { %v1366_v9 = vpop.permute.xlu1 %1365 }
0x1d72   :  { %vm1367_vm14 = vcmp.eq.s32.totalorder %v1363_v8, %v1366_v9 }
0x1d73   :  { %vm1370_vm15 = vmand %vm1367_vm14, %vm1369_vm13 }
0x1d74   :  { %v2084_v12 = vsel %vm1370_vm15, 1.0, %v2484_v0 }
0x1d75   :  { %v1373_v13 = vpack.c.bf16 %v2084_v12, %v2084_v12 }
0x1d77   :  { %2386 = vmatmul.mubr.msk.bf16.vlgmr.msra.gmra.mrb[44].mxu1 %vm117_vm9, %v1373_v13 }
0x1d78   :  { %2398 = vmatpush3.bf16.msra.mxu1 %v2487_v10  ;;  %2401 = vmatprep.mubr.msk.bf16.mxu1 %vm2485_vm1, %v2484_v0 }
0x1d79   :  { %2399 = vmatprep.subr.bf16.mxu1 %v2484_v0 }
0x1d7c   :  { %2400 = vmatpush3.bf16.msra.mxu1 %v2559_v11 }
0x1d7d   :  { %2413 = vmatprep.subr.bf16.mxu1 %v2484_v0 }
0x1e4a   :  { %v1411_v15 = vpop.f32.mrb[44].mxu1 }
0x1e4b   :  { %vm1417_vm0 = vcmp.ge.f32.partialorder %v1362_v6, %v1411_v15  ;;  %v1420_v16 = vsub.f32 %v1362_v6, %v1411_v15  ;;  %v2387_v17 = vpop.f32.mrb[45].mxu1 }
0x1e4c   :  { %v1414_v18 = vpop.f32.mrb[46].mxu1  ;;  %v1419_v19 = vsel %vm1417_vm0, %v1418_v14, %v1360_v4  ;;  %v1663_v17 = vand.u32 16, %v2583_v26 }
0x1e4d   :  { %v2388_v20 = vpop.f32.mrb[47].mxu1  ;;  %1424 = vperm.xlu0 %2473, %v1419_v19   ;;  %v1421_v21 = vsel %vm1417_vm0, %v1420_v16, %v1362_v6  ;;  %v1477_v31 = vor.u32 256, %v1419_v19  ;;  %vm1605_vm0 = vcmp.eq.s32.totalorder %v1604_v2, 0  ;;  %v1658_v18 = vand.u32 4294967264, %v2583_v26 }
0x1ecc   :  { %v1425_v28 = vpop.permute.xlu0 %1424 }
0x1ecd   :  { %vm1426_vm4 = vcmp.eq.s32.totalorder %v1422_v27, %v1425_v28 }
0x1ece   :  { %vm1429_vm5 = vmand %vm1426_vm4, %vm1428_vm2 }
0x1ecf   :  { %v2086_v29 = vsel %vm1429_vm5, 1.0, %v2484_v0 }
0x1ed0   :  { %v1432_v30 = vpack.c.bf16 %v2086_v29, %v2086_v29 }
0x1ed2   :  { %2394 = vmatmul.mubr.msk.bf16.vlgmr.msra.gmra.mrb[44].mxu0 %vm117_vm9, %v1432_v30 }
0x1ed3   :  { %2406 = vmatpush3.bf16.msra.mxu0 %v2487_v10  ;;  %2409 = vmatprep.mubr.msk.bf16.mxu0 %vm2485_vm1, %v2484_v0 }
0x1ed4   :  { %2407 = vmatprep.subr.bf16.mxu0 %v2484_v0 }
0x1ed7   :  { %2408 = vmatpush3.bf16.msra.mxu0 %v2559_v11 }
0x1ed8   :  { %2421 = vmatprep.subr.bf16.mxu0 %v2484_v0 }
0x1fa5   :  { %v1470_v32 = vpop.f32.mrb[44].mxu0 }
0x1fa6   :  { %vm1476_vm6 = vcmp.ge.f32.partialorder %v1421_v21, %v1470_v32  ;;  %v1479_v33 = vsub.f32 %v1421_v21, %v1470_v32  ;;  %v2395_v34 = vpop.f32.mrb[45].mxu0 }
0x1fa7   :  { %v1473_v35 = vpop.f32.mrb[46].mxu0  ;;  %v1478_v36 = vsel %vm1476_vm6, %v1477_v31, %v1419_v19  ;;  %v1722_v34 = vand.u32 8, %v2583_v26 }
0x1fa8   :  { %1483 = vperm.xlu1 %2474, %v1478_v36   ;;  %v2396_v37 = vpop.f32.mrb[47].mxu0  ;;  %v1480_v38 = vsel %vm1476_vm6, %v1479_v33, %v1421_v21  ;;  %v1536_v44 = vor.u32 128, %v1478_v36  ;;  %vm1664_vm6 = vcmp.eq.s32.totalorder %v1663_v17, 0  ;;  %v1717_v35 = vand.u32 4294967280, %v2583_v26 }
0x2027   :  { %v1484_v41 = vpop.permute.xlu1 %1483 }
0x2028   :  { %vm1485_vm8 = vcmp.eq.s32.totalorder %v1481_v40, %v1484_v41 }
0x2029   :  { %vm1488_vm10 = vmand %vm1485_vm8, %vm1487_vm7 }
0x202a   :  { %v2088_v42 = vsel %vm1488_vm10, 1.0, %v2484_v0 }
0x202b   :  { %v1491_v43 = vpack.c.bf16 %v2088_v42, %v2088_v42 }
0x202d   :  { %2402 = vmatmul.mubr.msk.bf16.vlgmr.msra.gmra.mrb[48].mxu1 %vm117_vm9, %v1491_v43 }
0x202e   :  { %2414 = vmatpush3.bf16.msra.mxu1 %v2487_v10  ;;  %2417 = vmatprep.mubr.msk.bf16.mxu1 %vm2485_vm1, %v2484_v0 }
0x202f   :  { %2415 = vmatprep.subr.bf16.mxu1 %v2484_v0 }
0x2032   :  { %2416 = vmatpush3.bf16.msra.mxu1 %v2559_v11 }
0x2033   :  { %2429 = vmatprep.subr.bf16.mxu1 %v2484_v0 }
0x2100   :  { %v1529_v45 = vpop.f32.mrb[48].mxu1 }
0x2101   :  { %vm1535_vm11 = vcmp.ge.f32.partialorder %v1480_v38, %v1529_v45  ;;  %v1538_v46 = vsub.f32 %v1480_v38, %v1529_v45  ;;  %v2403_v47 = vpop.f32.mrb[49].mxu1 }
0x2102   :  { %v1532_v48 = vpop.f32.mrb[50].mxu1  ;;  %v1537_v49 = vsel %vm1535_vm11, %v1536_v44, %v1478_v36  ;;  %v1781_v47 = vand.u32 4, %v2583_v26 }
0x2103   :  { %v2404_v50 = vpop.f32.mrb[51].mxu1  ;;  %1542 = vperm.xlu0 %2473, %v1537_v49   ;;  %v1539_v51 = vsel %vm1535_vm11, %v1538_v46, %v1480_v38  ;;  %v1595_v57 = vor.u32 64, %v1537_v49  ;;  %vm1723_vm11 = vcmp.eq.s32.totalorder %v1722_v34, 0  ;;  %v1776_v48 = vand.u32 4294967288, %v2583_v26 }
0x2182   :  { %v1543_v54 = vpop.permute.xlu0 %1542 }
0x2183   :  { %vm1544_vm13 = vcmp.eq.s32.totalorder %v1540_v53, %v1543_v54 }
0x2184   :  { %vm1547_vm14 = vmand %vm1544_vm13, %vm1546_vm12 }
0x2185   :  { %v2090_v55 = vsel %vm1547_vm14, 1.0, %v2484_v0 }
0x2186   :  { %v1550_v56 = vpack.c.bf16 %v2090_v55, %v2090_v55 }
0x2188   :  { %2410 = vmatmul.mubr.msk.bf16.vlgmr.msra.gmra.mrb[48].mxu0 %vm117_vm9, %v1550_v56 }
0x2189   :  { %2422 = vmatpush3.bf16.msra.mxu0 %v2487_v10  ;;  %2425 = vmatprep.mubr.msk.bf16.mxu0 %vm2485_vm1, %v2484_v0 }
0x218a   :  { %2423 = vmatprep.subr.bf16.mxu0 %v2484_v0 }
0x218d   :  { %2424 = vmatpush3.bf16.msra.mxu0 %v2559_v11 }
0x218e   :  { %2437 = vmatprep.subr.bf16.mxu0 %v2484_v0 }
0x225b   :  { %v1588_v58 = vpop.f32.mrb[48].mxu0 }
0x225c   :  { %vm1594_vm15 = vcmp.ge.f32.partialorder %v1539_v51, %v1588_v58  ;;  %v1597_v59 = vsub.f32 %v1539_v51, %v1588_v58  ;;  %v2411_v60 = vpop.f32.mrb[49].mxu0 }
0x225d   :  { %v1591_v61 = vpop.f32.mrb[50].mxu0  ;;  %v1596_v62 = vsel %vm1594_vm15, %v1595_v57, %v1537_v49  ;;  %v1840_v60 = vand.u32 2, %v2583_v26 }
0x225e   :  { %1601 = vperm.xlu1 %2474, %v1596_v62   ;;  %v2412_v63 = vpop.f32.mrb[51].mxu0  ;;  %v1598_v1 = vsel %vm1594_vm15, %v1597_v59, %v1539_v51  ;;  %v1654_v7 = vor.u32 32, %v1596_v62  ;;  %vm1782_vm15 = vcmp.eq.s32.totalorder %v1781_v47, 0  ;;  %v1835_v61 = vand.u32 4294967292, %v2583_v26 }
0x22dd   :  { %v1602_v4 = vpop.permute.xlu1 %1601 }
0x22de   :  { %vm1603_vm2 = vcmp.eq.s32.totalorder %v1599_v3, %v1602_v4 }
0x22df   :  { %vm1606_vm4 = vmand %vm1603_vm2, %vm1605_vm0 }
0x22e0   :  { %v2092_v5 = vsel %vm1606_vm4, 1.0, %v2484_v0 }
0x22e1   :  { %v1609_v6 = vpack.c.bf16 %v2092_v5, %v2092_v5 }
0x22e3   :  { %2418 = vmatmul.mubr.msk.bf16.vlgmr.msra.gmra.mrb[52].mxu1 %vm117_vm9, %v1609_v6 }
0x22e4   :  { %2430 = vmatpush3.bf16.msra.mxu1 %v2487_v10  ;;  %2433 = vmatprep.mubr.msk.bf16.mxu1 %vm2485_vm1, %v2484_v0 }
0x22e5   :  { %2431 = vmatprep.subr.bf16.mxu1 %v2484_v0 }
0x22e8   :  { %2432 = vmatpush3.bf16.msra.mxu1 %v2559_v11 }
0x22e9   :  { %2445 = vmatprep.subr.bf16.mxu1 %v2484_v0 }
0x23b6   :  { %v1647_v8 = vpop.f32.mrb[52].mxu1 }
0x23b7   :  { %vm1653_vm5 = vcmp.ge.f32.partialorder %v1598_v1, %v1647_v8  ;;  %v1656_v9 = vsub.f32 %v1598_v1, %v1647_v8  ;;  %v2419_v12 = vpop.f32.mrb[53].mxu1 }
0x23b8   :  { %v1650_v13 = vpop.f32.mrb[54].mxu1  ;;  %v1655_v14 = vsel %vm1653_vm5, %v1654_v7, %v1596_v62  ;;  %v1899_v12 = vand.u32 1, %v2583_v26 }
0x23b9   :  { %v2420_v15 = vpop.f32.mrb[55].mxu1  ;;  %1660 = vperm.xlu0 %2473, %v1655_v14   ;;  %v1657_v16 = vsel %vm1653_vm5, %v1656_v9, %v1598_v1  ;;  %v1713_v24 = vor.u32 16, %v1655_v14  ;;  %vm1841_vm5 = vcmp.eq.s32.totalorder %v1840_v60, 0 }
0x2438   :  { %v1661_v19 = vpop.permute.xlu0 %1660 }
0x2439   :  { %vm1662_vm7 = vcmp.eq.s32.totalorder %v1658_v18, %v1661_v19 }
0x243a   :  { %vm1665_vm8 = vmand %vm1662_vm7, %vm1664_vm6 }
0x243b   :  { %v2094_v20 = vsel %vm1665_vm8, 1.0, %v2484_v0 }
0x243c   :  { %v1668_v21 = vpack.c.bf16 %v2094_v20, %v2094_v20 }
0x243e   :  { %2426 = vmatmul.mubr.msk.bf16.vlgmr.msra.gmra.mrb[52].mxu0 %vm117_vm9, %v1668_v21 }
0x243f   :  { %2438 = vmatpush3.bf16.msra.mxu0 %v2487_v10  ;;  %2441 = vmatprep.mubr.msk.bf16.mxu0 %vm2485_vm1, %v2484_v0 }
0x2440   :  { %2439 = vmatprep.subr.bf16.mxu0 %v2484_v0 }
0x2443   :  { %2440 = vmatpush3.bf16.msra.mxu0 %v2559_v11 }
0x2444   :  { %2453 = vmatprep.subr.bf16.mxu0 %v2484_v0 }
0x2511   :  { %v1706_v27 = vpop.f32.mrb[52].mxu0 }
0x2512   :  { %vm1712_vm10 = vcmp.ge.f32.partialorder %v1657_v16, %v1706_v27  ;;  %v1715_v28 = vsub.f32 %v1657_v16, %v1706_v27  ;;  %v2427_v29 = vpop.f32.mrb[53].mxu0 }
0x2513   :  { %v1709_v30 = vpop.f32.mrb[54].mxu0  ;;  %v1714_v31 = vsel %vm1712_vm10, %v1713_v24, %v1655_v14 }
0x2514   :  { %1719 = vperm.xlu1 %2474, %v1714_v31   ;;  %v2428_v32 = vpop.f32.mrb[55].mxu0  ;;  %v1716_v33 = vsel %vm1712_vm10, %v1715_v28, %v1657_v16  ;;  %v1772_v39 = vor.u32 8, %v1714_v31 }
0x2593   :  { %v1720_v36 = vpop.permute.xlu1 %1719 }
0x2594   :  { %vm1721_vm12 = vcmp.eq.s32.totalorder %v1717_v35, %v1720_v36 }
0x2595   :  { %vm1724_vm13 = vmand %vm1721_vm12, %vm1723_vm11 }
0x2596   :  { %v2096_v37 = vsel %vm1724_vm13, 1.0, %v2484_v0 }
0x2597   :  { %v1727_v38 = vpack.c.bf16 %v2096_v37, %v2096_v37 }
0x2599   :  { %2434 = vmatmul.mubr.msk.bf16.vlgmr.msra.gmra.mrb[56].mxu1 %vm117_vm9, %v1727_v38 }
0x259a   :  { %2446 = vmatpush3.bf16.msra.mxu1 %v2487_v10  ;;  %2449 = vmatprep.mubr.msk.bf16.mxu1 %vm2485_vm1, %v2484_v0 }
0x259b   :  { %2447 = vmatprep.subr.bf16.mxu1 %v2484_v0 }
0x259e   :  { %2448 = vmatpush3.bf16.msra.mxu1 %v2559_v11 }
0x259f   :  { %2461 = vmatprep.subr.bf16.mxu1 %v2484_v0 }
0x266c   :  { %v1765_v40 = vpop.f32.mrb[56].mxu1 }
0x266d   :  { %vm1771_vm14 = vcmp.ge.f32.partialorder %v1716_v33, %v1765_v40  ;;  %v1774_v41 = vsub.f32 %v1716_v33, %v1765_v40  ;;  %v2435_v42 = vpop.f32.mrb[57].mxu1 }
0x266e   :  { %v1768_v43 = vpop.f32.mrb[58].mxu1  ;;  %v1773_v44 = vsel %vm1771_vm14, %v1772_v39, %v1714_v31 }
0x266f   :  { %v2436_v45 = vpop.f32.mrb[59].mxu1  ;;  %1778 = vperm.xlu0 %2473, %v1773_v44   ;;  %v1775_v46 = vsel %vm1771_vm14, %v1774_v41, %v1716_v33  ;;  %v1831_v52 = vor.u32 4, %v1773_v44 }
0x26ee   :  { %v1779_v49 = vpop.permute.xlu0 %1778 }
0x26ef   :  { %vm1780_vm0 = vcmp.eq.s32.totalorder %v1776_v48, %v1779_v49 }
0x26f0   :  { %vm1783_vm2 = vmand %vm1780_vm0, %vm1782_vm15 }
0x26f1   :  { %v2098_v50 = vsel %vm1783_vm2, 1.0, %v2484_v0  ;;  %vm2031_vm2 = vcmask 7168  }
0x26f2   :  { %v1786_v51 = vpack.c.bf16 %v2098_v50, %v2098_v50 }
0x26f4   :  { %2442 = vmatmul.mubr.msk.bf16.vlgmr.msra.gmra.mrb[56].mxu0 %vm117_vm9, %v1786_v51 }
0x26f5   :  { %2454 = vmatpush3.bf16.msra.mxu0 %v2487_v10  ;;  %2457 = vmatprep.mubr.msk.bf16.mxu0 %vm2485_vm1, %v2484_v0 }
0x26f6   :  { %2455 = vmatprep.subr.bf16.mxu0 %v2484_v0 }
0x26f9   :  { %2456 = vmatpush3.bf16.msra.mxu0 %v2559_v11 }
0x27c7   :  { %v1824_v53 = vpop.f32.mrb[56].mxu0 }
0x27c8   :  { %vm1830_vm4 = vcmp.ge.f32.partialorder %v1775_v46, %v1824_v53  ;;  %v1833_v54 = vsub.f32 %v1775_v46, %v1824_v53  ;;  %v2443_v55 = vpop.f32.mrb[57].mxu0 }
0x27c9   :  { %v1827_v56 = vpop.f32.mrb[58].mxu0  ;;  %v1832_v57 = vsel %vm1830_vm4, %v1831_v52, %v1773_v44 }
0x27ca   :  { %1837 = vperm.xlu1 %2474, %v1832_v57   ;;  %v2444_v58 = vpop.f32.mrb[59].mxu0  ;;  %v1834_v59 = vsel %vm1830_vm4, %v1833_v54, %v1775_v46  ;;  %v1890_v2 = vor.u32 2, %v1832_v57 }
0x2849   :  { %v1838_v62 = vpop.permute.xlu1 %1837 }
0x284a   :  { %vm1839_vm6 = vcmp.eq.s32.totalorder %v1835_v61, %v1838_v62 }
0x284b   :  { %vm1842_vm7 = vmand %vm1839_vm6, %vm1841_vm5 }
0x284c   :  { %v2100_v63 = vsel %vm1842_vm7, 1.0, %v2484_v0 }
0x284d   :  { %v1845_v1 = vpack.c.bf16 %v2100_v63, %v2100_v63 }
0x284f   :  { %2450 = vmatmul.mubr.msk.bf16.vlgmr.msra.gmra.mrb[60].mxu1 %vm117_vm9, %v1845_v1 }
0x2850   :  { %2462 = vmatpush3.bf16.msra.mxu1 %v2487_v10  ;;  %2465 = vmatprep.mubr.msk.bf16.mxu1 %vm2485_vm1, %v2484_v0  ;;  %v1894_v10 = vand.u32 4294967294, %v2583_v26  ;;  %vm1900_vm1 = vcmp.eq.s32.totalorder %v1899_v12, 0 }
0x2851   :  { %2463 = vmatprep.subr.bf16.mxu1 %v2484_v0 }
0x2854   :  { %2464 = vmatpush3.bf16.msra.mxu1 %v2559_v11 }
0x2922   :  { %v1883_v3 = vpop.f32.mrb[60].mxu1 }
0x2923   :  { %vm1889_vm8 = vcmp.ge.f32.partialorder %v1834_v59, %v1883_v3  ;;  %v1892_v4 = vsub.f32 %v1834_v59, %v1883_v3  ;;  %v2451_v5 = vpop.f32.mrb[61].mxu1 }
0x2924   :  { %v1886_v6 = vpop.f32.mrb[62].mxu1  ;;  %v1891_v7 = vsel %vm1889_vm8, %v1890_v2, %v1832_v57 }
0x2925   :  { %v2452_v8 = vpop.f32.mrb[63].mxu1  ;;  %1896 = vperm.xlu0 %2473, %v1891_v7   ;;  %v1893_v9 = vsel %vm1889_vm8, %v1892_v4, %v1834_v59  ;;  %v1949_v15 = vor.u32 1, %v1891_v7 }
0x29a4   :  { %v1897_v13 = vpop.permute.xlu0 %1896 }
0x29a5   :  { %vm1898_vm10 = vcmp.eq.s32.totalorder %v1894_v10, %v1897_v13 }
0x29a6   :  { %vm1901_vm11 = vmand %vm1898_vm10, %vm1900_vm1 }
0x29a7   :  { %v2102_v11 = vsel %vm1901_vm11, 1.0, %v2484_v0 }
0x29a8   :  { %v1904_v14 = vpack.c.bf16 %v2102_v11, %v2102_v11 }
0x29aa   :  { %2458 = vmatmul.mubr.msk.bf16.vlgmr.msra.gmra.mrb[60].mxu0 %vm117_vm9, %v1904_v14 }
0x2a7d   :  { %v1942_v16 = vpop.f32.mrb[60].mxu0 }
0x2a7e   :  { %vm1948_vm12 = vcmp.ge.f32.partialorder %v1893_v9, %v1942_v16  ;;  %v2459_v17 = vpop.f32.mrb[61].mxu0 }
0x2a7f   :  { %v1950_v18 = vsel %vm1948_vm12, %v1949_v15, %v1891_v7  ;;  %v1945_v19 = vpop.f32.mrb[62].mxu0 }
0x2a80   :  { %1953 = vperm.xlu1 %2474, %v1950_v18   ;;  %v2460_v20 = vpop.f32.mrb[63].mxu0 }
0x2aff   :  { %v1954_v21 = vpop.permute.xlu1 %1953 }
0x2b00   :  { %vm1956_vm13 = vcmp.le.f32.partialorder %v2583_v26, %v1954_v21  ;;  %vm2003_vm14 = vcmp.gt.f32.partialorder %v2583_v26, %v1954_v21 }
0x2b01   :  { %v2104_v24 = vsel %vm1956_vm13, 1.0, %v2484_v0  ;;  %v2004_v27 = vsel %vm2003_vm14, %v2583_v26, inf  ;;  %v116_v0 = vsel %vm115_vm3, %v2577_v25, 0.0  ;;  %v2483_v25 = vld [vmem:[%s2910_s5] sm:$0xff] }
0x2b02   :  { %v1959_v28 = vpack.c.bf16 %v2104_v24, %v2104_v24  ;;  %v2005_v29 = vsel %vm117_vm9, %v2004_v27, inf  ;;  %v118_v39 = vsel %vm117_vm9, %v116_v0, 0.0  ;;  %vm2029_vm3 = vcmp.ge.s32.totalorder %v2483_v25, 0 }
0x2b03   :  { %2006 = vmin.xlane.f32.xlu0 %v2005_v29 }
0x2b04   :  { %2466 = vmatmul.mubr.msk.bf16.vlgmr.msra.gmra.mrb[64].mxu1 %vm117_vm9, %v1959_v28 }
0x2b90   :  { %v2007_v31 = vpop.xlane.xlu0 %2006 }
0x2bd7   :  { %v1997_v30 = vpop.f32.mrb[64].mxu1 }
0x2bd8   :  { %vm2008_vm15 = vcmp.gt.f32.partialorder %v1997_v30, 19.0  ;;  %v2467_v32 = vpop.f32.mrb[65].mxu1 }
0x2bd9   :  { %v2009_v33 = vsel %vm2008_vm15, %v1950_v18, %v2007_v31  ;;  %v2000_v34 = vpop.f32.mrb[66].mxu1 }
0x2bda   :  { %v2010_v35 = vsub.f32 %v2009_v33, %v1950_v18  ;;  %v2468_v36 = vpop.f32.mrb[67].mxu1 }
0x2bdc   :  { %v2011_v37 = vmul.f32 0.4, %v2010_v35 }
0x2bde   :  { %v2012_v38 = vadd.f32 %v2011_v37, %v1950_v18 }
0x2be0   :  { %2015 = vperm.xlu1 %2474, %v2012_v38  }
0x2c04   :  { %119 = vadd.xlane.f32.xlu1 %v118_v39 }
0x2c5f   :  { %v2016_v40 = vpop.permute.xlu1 %2015 }
0x2c60   :  { %vm2018_vm0 = vcmp.ge.f32.partialorder %v2583_v26, %v2016_v40 }
0x2c61   :  { %v2019_v41 = vsel %vm2018_vm0, %v2583_v26, 0.0 }
0x2c62   :  { %v2020_v42 = vsel %vm117_vm9, %v2019_v41, 0.0 }
0x2c63   :  { %2021 = vadd.xlane.f32.xlu0 %v2020_v42 }
0x2c91   :  { %v120_v43 = vpop.xlane.xlu1 %119 }
0x2cf0   :  { %v2022_v44 = vpop.xlane.xlu0 %2021 }
0x2cf1   :  { %v2023_v45 = vadd.f32 %v2022_v44, %v120_v43 }
0x2cf3   :  { %2479 = vrcp.f32 %v2023_v45 }
0x2cfd   :  { %v2480_v46 = vpop.eup %2479 }
0x2cfe   :  { %v2025_v47 = vmul.f32 %v2480_v46, %v120_v43 }
0x2d00   :  { %2481 = vlog2.f32 %v2025_v47 }
0x2d0a   :  { %v2482_v22 = vpop.eup %2481 }
0x2d0b   :  { %v2027_v23 = vmul.f32 0.6931472, %v2482_v22 }
0x2d0d   :  { %v2028_v48 = vsub.f32 0.0, %v2027_v23 }
0x2d0f   :  { %v2030_v26 = vsel %vm2029_vm3, %v2028_v48, 0.0 }
0x2d10   :  { %2032 = vst.msk [vmem:[%s2914_s6] sm:$0xff] %vm2031_vm2, %v2030_v26 }

</bundles_post_ra>
